<compile_context>
chip_gen: v6e
topology: v6e:2x2x1
jax: 0.10.0
libtpu: 0.0.40
codegen_flags: <defaults>
</compile_context>

<pallas_src>
import functools

import jax
import jax.numpy as jnp
from jax.experimental import pallas as pl
from jax.experimental.pallas import tpu as pltpu

BN_EPS = 1e-5
OUT_PAD = 128   # lane-dense padded width of the final (B, 3) output
ROW_PAD = 8     # sublane-padded output rows -> unmasked full (8, 128) store


def _round_up(n, m):
    return (n + m - 1) // m * m


def cnn_fused_kernel(x_ref, ps_ref, ws_ref, wd_ref, out_ref, *,
                     k2, k3, batch, seq_len, feat, dense, lay):
    T, C, D = seq_len, feat, dense
    BT = batch * T
    TD = T * D
    bf16, f32 = jnp.bfloat16, jnp.float32

    # ---- packed f32 vectors (rows: b1,g1,be1, b2,g2,be2, b3,g3,be3) -------
    bn = ps_ref[0:9, 0:C]
    b1, g1, be1 = bn[0:1], bn[1:2], bn[2:3]
    b2, g2, be2 = bn[3:4], bn[4:5], bn[5:6]
    b3, g3, be3 = bn[6:7], bn[7:8], bn[8:9]
    bf1 = ps_ref[lay['bf1']:lay['bf1'] + 1, 0:D]
    bf2 = ps_ref[lay['bf2']:lay['bf2'] + 1, 0:OUT_PAD]

    # ---- packed bf16 MXU operands, sliced straight off the slab refs ------
    w1 = ws_ref[lay['w1']:lay['w1'] + 3, 0:C]
    w2 = ws_ref[lay['w2']:lay['w2'] + k2 * C, 0:C]
    w3 = ws_ref[lay['w3']:lay['w3'] + k3 * C, 0:C]
    wf2 = ws_ref[lay['wf2']:lay['wf2'] + D, 0:OUT_PAD]
    sel = ws_ref[lay['sel']:lay['sel'] + ROW_PAD, 0:BT]
    fold = ws_ref[lay['fold']:lay['fold'] + TD, 0:D]
    wf1 = wd_ref[lay['wf1']:lay['wf1'] + C, :]
    mask = wd_ref[lay['mask']:lay['mask'] + BT, :].astype(f32)   # 0/1, (BT, TD)

    # time index of each (B*T) row -- tiny, kept in-kernel
    trow = jax.lax.broadcasted_iota(jnp.int32, (BT, 1), 0) % T

    def bn_relu(h, gamma, beta):
        # training-mode BN over all B*T rows: ONE cross-sublane reduce over
        # [h | h*h]; single-pass variance clamped at 0 (NaN-safe).
        stats = jnp.mean(jnp.concatenate([h, h * h], axis=1),
                         axis=0, keepdims=True)                  # (1, 2C)
        mean = stats[:, 0:C]
        var = jnp.maximum(stats[:, C:2 * C] - mean * mean, 0.0)
        hn = (h - mean) * jax.lax.rsqrt(var + BN_EPS) * gamma + beta
        return jnp.maximum(hn, 0.0)

    def shift_rows(h, s):
        # y[b*T + t, :] = h[b*T + (t+s), :] if 0 <= t+s < T else 0 (zero pad)
        if s == 0:
            return h
        rolled = jnp.roll(h, -s, axis=0)
        valid = jnp.logical_and(trow + s >= 0, trow + s < T)
        return jnp.where(valid, rolled, 0.0)

    def conv_time(h, w, bias, k):
        # SAME-padded 1-D conv along time as ONE wide matmul (k*C contraction)
        pad = k // 2
        taps = [shift_rows(h, j - pad) for j in range(k)]
        wide = jnp.concatenate(taps, axis=1) if k > 1 else taps[0]
        return jnp.dot(wide.astype(bf16), w, preferred_element_type=f32) + bias

    # conv1: kernel (1,1) -> pure channel matmul (3 -> C)
    h = jnp.dot(x_ref[...].astype(bf16), w1, preferred_element_type=f32) + b1
    h = bn_relu(h, g1, be1)
    # conv2 / conv3: (k,1) convs along time
    h = bn_relu(conv_time(h, w2, b2, k2), g2, be2)
    h = bn_relu(conv_time(h, w3, b3, k3), g3, be3)

    # ---- fc1 with the PyTorch channel-major flatten folded into wf1 -------
    # U[r, t*D+d] = sum_c h[r,c] * fc1.W.T[c*T+t, d]; keep only the block
    # t == (r mod T) via the hoisted mask, then fold (sel @ um) @ fold.
    U = jnp.dot(h.astype(bf16), wf1, preferred_element_type=f32)     # (BT, TD)
    um = U * mask                                                    # f32
    p = jnp.dot(sel, um.astype(bf16), preferred_element_type=f32)    # (8, TD)
    q = jnp.dot(p.astype(bf16), fold, preferred_element_type=f32)    # (8, D)
    z = jnp.maximum(q + bf1, 0.0)

    # fc2 into a sublane+lane dense (8, 128) slab -> unmasked full-tile store
    out_ref[...] = jnp.dot(z.astype(bf16), wf2, preferred_element_type=f32) + bf2


def cnn_forward(x, params, *, k2, k3):
    """x: (B, T, 3) float32 -- same input as the PyTorch forward. Returns (B, 3)."""
    B, T, c_in = x.shape
    assert B <= ROW_PAD
    C = params["w1"].shape[1]
    D = params["wf1"].shape[1]
    BT, TD = B * T, T * D
    f32, bf16 = jnp.float32, jnp.bfloat16

    x2 = x.reshape(BT, c_in)

    # ---- operand 2: one (32, 128) f32 slab for every small f32 vector -----
    lay = {'bf1': 16, 'bf2': 24}
    ps = jnp.zeros((32, 128), f32)
    bn_rows = jnp.concatenate(
        [params[n] for n in ("b1", "g1", "be1", "b2", "g2", "be2",
                             "b3", "g3", "be3")], axis=0)             # (9, C)
    ps = ps.at[0:9, 0:C].set(bn_rows)
    ps = ps.at[lay['bf1']:lay['bf1'] + 1, 0:D].set(params["bf1"])
    ps = ps.at[lay['bf2']:lay['bf2'] + 1, 0:3].set(params["bf2"])

    # ---- operand 3: one bf16 slab (width 128) for all narrow MXU operands --
    w2k = params["w2"].reshape(k2 * C, C)                # (tap,ci,co)->(tap*ci,co)
    w3k = params["w3"].reshape(k3 * C, C)
    sel = (jnp.arange(BT)[None, :] // T ==
           jnp.arange(ROW_PAD)[:, None]).astype(bf16)                 # (8, BT)
    fold = (jnp.arange(TD)[:, None] % D ==
            jnp.arange(D)[None, :]).astype(bf16)                      # (TD, D)

    off = 0
    def seg(name, rows):
        nonlocal off
        lay[name] = off
        off += _round_up(rows, 16)       # bf16 sublane tile = 16
    seg('w1', 3); seg('w2', k2 * C); seg('w3', k3 * C)
    seg('wf2', D); seg('sel', ROW_PAD); seg('fold', TD)
    ws = jnp.zeros((off, 128), bf16)
    ws = ws.at[lay['w1']:lay['w1'] + 3, 0:C].set(params["w1"].astype(bf16))
    ws = ws.at[lay['w2']:lay['w2'] + k2 * C, 0:C].set(w2k.astype(bf16))
    ws = ws.at[lay['w3']:lay['w3'] + k3 * C, 0:C].set(w3k.astype(bf16))
    ws = ws.at[lay['wf2']:lay['wf2'] + D, 0:3].set(params["wf2"].astype(bf16))
    ws = ws.at[lay['sel']:lay['sel'] + ROW_PAD, 0:BT].set(sel)
    ws = ws.at[lay['fold']:lay['fold'] + TD, 0:D].set(fold)

    # ---- operand 4: bf16 wide slab: fc1 weight (channel-major) + t mask ----
    wf1k = params["wf1"].reshape(C, TD).astype(bf16)    # [c,t*D+d]=W.T[c*T+t,d]
    mask = (jnp.arange(BT)[:, None] % T ==
            jnp.arange(TD)[None, :] // D).astype(bf16)                # (BT, TD)
    lay['wf1'] = 0
    lay['mask'] = _round_up(C, 16)
    wd = jnp.zeros((lay['mask'] + _round_up(BT, 16), TD), bf16)
    wd = wd.at[0:C, :].set(wf1k)
    wd = wd.at[lay['mask']:lay['mask'] + BT, :].set(mask)

    out_p = pl.pallas_call(
        functools.partial(cnn_fused_kernel, k2=k2, k3=k3, batch=B, seq_len=T,
                          feat=C, dense=D, lay=lay),
        out_shape=jax.ShapeDtypeStruct((ROW_PAD, OUT_PAD), f32),
        in_specs=[pl.BlockSpec(memory_space=pltpu.MemorySpace.VMEM)] * 4,
        out_specs=pl.BlockSpec(memory_space=pltpu.MemorySpace.VMEM),
    )(x2, ps, ws, wd)

    return out_p[:B, :3]


def init_params(key, *, features, dense, k1, k2, k3, seq_len):
    """Deterministic synthetic parameters with the shapes the module implies."""
    assert k1 == 1, "conv1 kernel is (1, k1) on width 1 -> k1 must be 1"
    assert k2 % 2 == 1 and k3 % 2 == 1, "SAME padding implemented for odd kernels"
    C, D = 2 ** features, 2 ** dense
    ks = jax.random.split(key, 5)

    def rnd(k, shape, fan_in):
        return jax.random.normal(k, shape, jnp.float32) / jnp.sqrt(float(fan_in))

    return dict(
        # conv1.weight (C, 3, 1, 1) passed as (ci, co)
        w1=rnd(ks[0], (3, C), 3), b1=jnp.zeros((1, C), jnp.float32),
        g1=jnp.ones((1, C), jnp.float32), be1=jnp.zeros((1, C), jnp.float32),
        # conv2.weight (C, C, k2, 1) passed as (tap j, ci, co)  [no kernel flip]
        w2=rnd(ks[1], (k2, C, C), k2 * C), b2=jnp.zeros((1, C), jnp.float32),
        g2=jnp.ones((1, C), jnp.float32), be2=jnp.zeros((1, C), jnp.float32),
        # conv3.weight (C, C, k3, 1) passed as (tap j, ci, co)
        w3=rnd(ks[2], (k3, C, C), k3 * C), b3=jnp.zeros((1, C), jnp.float32),
        g3=jnp.ones((1, C), jnp.float32), be3=jnp.zeros((1, C), jnp.float32),
        # fc1: Linear(C*T, D); wf1 = fc1.weight.T, rows ordered channel-major
        # (row index c*T + t) -- matches the PyTorch x.view(B, -1) flatten.
        wf1=rnd(ks[3], (C * seq_len, D), C * seq_len),
        bf1=jnp.zeros((1, D), jnp.float32),
        # fc2: Linear(D, 3)
        wf2=rnd(ks[4], (D, 3), D),
        bf2=jnp.zeros((1, 3), jnp.float32),
    )


if __name__ == "__main__":
    B, T = 2, 16
    features, dense = 4, 5          # C = 16, D = 32
    k1, k2, k3 = 1, 3, 5            # padding='SAME', activation='relu'

    key = jax.random.PRNGKey(0)
    kx, kp = jax.random.split(key)
    x = jax.random.normal(kx, (B, T, 3), jnp.float32)
    params = init_params(kp, features=features, dense=dense,
                         k1=k1, k2=k2, k3=k3, seq_len=T)

    fwd = jax.jit(functools.partial(cnn_forward, k2=k2, k3=k3))
    out = jax.block_until_ready(fwd(x, params))
    assert out.shape == (B, 3) and out.dtype == jnp.float32
    assert bool(jnp.all(jnp.isfinite(out)))
    print("KERNEL_OK")
</pallas_src>

<mosaic_0001>
module attributes {stable_mosaic.version = 11 : i64} {
  func.func @cnn_fused_kernel(%arg0: memref<32x3xf32, #tpu.memory_space<vmem>>, %arg1: memref<32x128xf32, #tpu.memory_space<vmem>>, %arg2: memref<704x128xbf16, #tpu.memory_space<vmem>>, %arg3: memref<48x512xbf16, #tpu.memory_space<vmem>>, %arg4: memref<8x128xf32, #tpu.memory_space<vmem>>) attributes {dimension_semantics = [], scalar_prefetch = 0 : i64, scratch_operands = 0 : i64, tpu.core_type = #tpu.core_type<tc>} {
    %c0 = arith.constant 0 : index
    %c0_0 = arith.constant 0 : index
    %0 = vector.load %arg1[%c0, %c0_0] : memref<32x128xf32, #tpu.memory_space<vmem>>, vector<9x16xf32>
    %1 = vector.extract_strided_slice %0 {offsets = [0, 0], sizes = [1, 16], strides = [1, 1]} : vector<9x16xf32> to vector<1x16xf32>
    %2 = vector.extract_strided_slice %0 {offsets = [1, 0], sizes = [1, 16], strides = [1, 1]} : vector<9x16xf32> to vector<1x16xf32>
    %3 = vector.extract_strided_slice %0 {offsets = [2, 0], sizes = [1, 16], strides = [1, 1]} : vector<9x16xf32> to vector<1x16xf32>
    %4 = vector.extract_strided_slice %0 {offsets = [3, 0], sizes = [1, 16], strides = [1, 1]} : vector<9x16xf32> to vector<1x16xf32>
    %5 = vector.extract_strided_slice %0 {offsets = [4, 0], sizes = [1, 16], strides = [1, 1]} : vector<9x16xf32> to vector<1x16xf32>
    %6 = vector.extract_strided_slice %0 {offsets = [5, 0], sizes = [1, 16], strides = [1, 1]} : vector<9x16xf32> to vector<1x16xf32>
    %7 = vector.extract_strided_slice %0 {offsets = [6, 0], sizes = [1, 16], strides = [1, 1]} : vector<9x16xf32> to vector<1x16xf32>
    %8 = vector.extract_strided_slice %0 {offsets = [7, 0], sizes = [1, 16], strides = [1, 1]} : vector<9x16xf32> to vector<1x16xf32>
    %9 = vector.extract_strided_slice %0 {offsets = [8, 0], sizes = [1, 16], strides = [1, 1]} : vector<9x16xf32> to vector<1x16xf32>
    %c16 = arith.constant 16 : index
    %c0_1 = arith.constant 0 : index
    %10 = vector.load %arg1[%c16, %c0_1] : memref<32x128xf32, #tpu.memory_space<vmem>>, vector<1x32xf32>
    %c24 = arith.constant 24 : index
    %c0_2 = arith.constant 0 : index
    %11 = vector.load %arg1[%c24, %c0_2] : memref<32x128xf32, #tpu.memory_space<vmem>>, vector<1x128xf32>
    %c0_3 = arith.constant 0 : index
    %c0_4 = arith.constant 0 : index
    %12 = vector.load %arg2[%c0_3, %c0_4] : memref<704x128xbf16, #tpu.memory_space<vmem>>, vector<3x16xbf16>
    %c16_5 = arith.constant 16 : index
    %c0_6 = arith.constant 0 : index
    %13 = vector.load %arg2[%c16_5, %c0_6] : memref<704x128xbf16, #tpu.memory_space<vmem>>, vector<48x16xbf16>
    %c64 = arith.constant 64 : index
    %c0_7 = arith.constant 0 : index
    %14 = vector.load %arg2[%c64, %c0_7] : memref<704x128xbf16, #tpu.memory_space<vmem>>, vector<80x16xbf16>
    %c144 = arith.constant 144 : index
    %c0_8 = arith.constant 0 : index
    %15 = vector.load %arg2[%c144, %c0_8] : memref<704x128xbf16, #tpu.memory_space<vmem>>, vector<32x128xbf16>
    %c176 = arith.constant 176 : index
    %c0_9 = arith.constant 0 : index
    %16 = vector.load %arg2[%c176, %c0_9] : memref<704x128xbf16, #tpu.memory_space<vmem>>, vector<8x32xbf16>
    %c192 = arith.constant 192 : index
    %c0_10 = arith.constant 0 : index
    %17 = vector.load %arg2[%c192, %c0_10] : memref<704x128xbf16, #tpu.memory_space<vmem>>, vector<512x32xbf16>
    %c0_11 = arith.constant 0 : index
    %c0_12 = arith.constant 0 : index
    %18 = vector.load %arg3[%c0_11, %c0_12] : memref<48x512xbf16, #tpu.memory_space<vmem>>, vector<16x512xbf16>
    %c16_13 = arith.constant 16 : index
    %c0_14 = arith.constant 0 : index
    %19 = vector.load %arg3[%c16_13, %c0_14] : memref<48x512xbf16, #tpu.memory_space<vmem>>, vector<32x512xbf16>
    %20 = arith.extf %19 : vector<32x512xbf16> to vector<32x512xf32>
    %21 = tpu.iota {dimensions = array<i32: 0>} : vector<32x1xi32>
    %c16_i32 = arith.constant 16 : i32
    %c0_i32 = arith.constant 0 : i32
    %22 = arith.cmpi eq, %c16_i32, %c0_i32 : i32
    %c1_i32 = arith.constant 1 : i32
    %23 = arith.select %22, %c1_i32, %c16_i32 : i32
    %24 = vector.broadcast %23 : i32 to vector<32x1xi32>
    %25 = arith.remsi %21, %24 : vector<32x1xi32>
    %c0_i32_15 = arith.constant 0 : i32
    %26 = vector.broadcast %c0_i32_15 : i32 to vector<32x1xi32>
    %27 = arith.cmpi ne, %25, %26 : vector<32x1xi32>
    %c0_i32_16 = arith.constant 0 : i32
    %28 = vector.broadcast %c0_i32_16 : i32 to vector<32x1xi32>
    %29 = arith.cmpi slt, %25, %28 : vector<32x1xi32>
    %c0_i32_17 = arith.constant 0 : i32
    %30 = arith.cmpi slt, %23, %c0_i32_17 : i32
    %31 = vector.broadcast %30 : i1 to vector<32x1xi1>
    %32 = vector.broadcast %31 : vector<32x1xi1> to vector<32x1xi1>
    %33 = arith.xori %29, %32 : vector<32x1xi1>
    %34 = arith.andi %33, %27 : vector<32x1xi1>
    %35 = vector.broadcast %23 : i32 to vector<32x1xi32>
    %36 = arith.addi %25, %35 : vector<32x1xi32>
    %37 = arith.select %34, %36, %25 : vector<32x1xi1>, vector<32x1xi32>
    %c0_18 = arith.constant 0 : index
    %c0_19 = arith.constant 0 : index
    %38 = vector.load %arg0[%c0_18, %c0_19] : memref<32x3xf32, #tpu.memory_space<vmem>>, vector<32x3xf32>
    %39 = arith.truncf %38 : vector<32x3xf32> to vector<32x3xbf16>
    %cst = arith.constant dense<0.000000e+00> : vector<32x16xf32>
    %40 = tpu.matmul %39, %12, %cst {dimension_numbers = #tpu.dot_dimension_numbers<[1], [0], [0], [1], [0, 0, 1, 1], [], []>} : vector<32x3xbf16>, vector<3x16xbf16>, vector<32x16xf32> -> vector<32x16xf32>
    %41 = vector.broadcast %1 : vector<1x16xf32> to vector<32x16xf32>
    %42 = arith.addf %40, %41 : vector<32x16xf32>
    %43 = arith.mulf %42, %42 : vector<32x16xf32>
    %44 = tpu.concatenate %42, %43 in 1 : vector<32x16xf32>, vector<32x16xf32> -> vector<32x32xf32>
    %cst_20 = arith.constant dense<0.000000e+00> : vector<32xf32>
    %45 = vector.multi_reduction <add>, %44, %cst_20 [0] : vector<32x32xf32> to vector<32xf32>
    %46 = vector.shape_cast %45 : vector<32xf32> to vector<1x32xf32>
    %cst_21 = arith.constant 3.200000e+01 : f32
    %47 = vector.broadcast %cst_21 : f32 to vector<1x32xf32>
    %48 = arith.divf %46, %47 : vector<1x32xf32>
    %49 = vector.extract_strided_slice %48 {offsets = [0, 0], sizes = [1, 16], strides = [1, 1]} : vector<1x32xf32> to vector<1x16xf32>
    %50 = vector.extract_strided_slice %48 {offsets = [0, 16], sizes = [1, 16], strides = [1, 1]} : vector<1x32xf32> to vector<1x16xf32>
    %51 = arith.mulf %49, %49 : vector<1x16xf32>
    %52 = arith.subf %50, %51 : vector<1x16xf32>
    %cst_22 = arith.constant 0.000000e+00 : f32
    %53 = vector.broadcast %cst_22 : f32 to vector<1x16xf32>
    %54 = arith.maximumf %52, %53 : vector<1x16xf32>
    %55 = vector.broadcast %49 : vector<1x16xf32> to vector<32x16xf32>
    %56 = arith.subf %42, %55 : vector<32x16xf32>
    %cst_23 = arith.constant 9.99999974E-6 : f32
    %57 = vector.broadcast %cst_23 : f32 to vector<1x16xf32>
    %58 = arith.addf %54, %57 : vector<1x16xf32>
    %59 = math.rsqrt %58 : vector<1x16xf32>
    %60 = vector.broadcast %59 : vector<1x16xf32> to vector<32x16xf32>
    %61 = arith.mulf %56, %60 : vector<32x16xf32>
    %62 = vector.broadcast %2 : vector<1x16xf32> to vector<32x16xf32>
    %63 = arith.mulf %61, %62 : vector<32x16xf32>
    %64 = vector.broadcast %3 : vector<1x16xf32> to vector<32x16xf32>
    %65 = arith.addf %63, %64 : vector<32x16xf32>
    %cst_24 = arith.constant 0.000000e+00 : f32
    %66 = vector.broadcast %cst_24 : f32 to vector<32x16xf32>
    %67 = arith.maximumf %65, %66 : vector<32x16xf32>
    %68 = vector.extract_strided_slice %67 {offsets = [31, 0], sizes = [1, 16], strides = [1, 1]} : vector<32x16xf32> to vector<1x16xf32>
    %69 = vector.extract_strided_slice %67 {offsets = [0, 0], sizes = [31, 16], strides = [1, 1]} : vector<32x16xf32> to vector<31x16xf32>
    %70 = tpu.concatenate %68, %69 in 0 : vector<1x16xf32>, vector<31x16xf32> -> vector<32x16xf32>
    %c-1_i32 = arith.constant -1 : i32
    %71 = vector.broadcast %c-1_i32 : i32 to vector<32x1xi32>
    %72 = arith.addi %37, %71 : vector<32x1xi32>
    %c0_i32_25 = arith.constant 0 : i32
    %73 = vector.broadcast %c0_i32_25 : i32 to vector<32x1xi32>
    %74 = arith.cmpi sge, %72, %73 : vector<32x1xi32>
    %c-1_i32_26 = arith.constant -1 : i32
    %75 = vector.broadcast %c-1_i32_26 : i32 to vector<32x1xi32>
    %76 = arith.addi %37, %75 : vector<32x1xi32>
    %c16_i32_27 = arith.constant 16 : i32
    %77 = vector.broadcast %c16_i32_27 : i32 to vector<32x1xi32>
    %78 = arith.cmpi slt, %76, %77 : vector<32x1xi32>
    %79 = arith.andi %74, %78 : vector<32x1xi1>
    %cst_28 = arith.constant 0.000000e+00 : f32
    %80 = vector.shape_cast %79 : vector<32x1xi1> to vector<32x1xi1>
    %81 = vector.broadcast %80 : vector<32x1xi1> to vector<32x16xi1>
    %82 = vector.broadcast %cst_28 : f32 to vector<32x16xf32>
    %83 = arith.select %81, %70, %82 : vector<32x16xi1>, vector<32x16xf32>
    %84 = vector.extract_strided_slice %67 {offsets = [1, 0], sizes = [31, 16], strides = [1, 1]} : vector<32x16xf32> to vector<31x16xf32>
    %85 = vector.extract_strided_slice %67 {offsets = [0, 0], sizes = [1, 16], strides = [1, 1]} : vector<32x16xf32> to vector<1x16xf32>
    %86 = tpu.concatenate %84, %85 in 0 : vector<31x16xf32>, vector<1x16xf32> -> vector<32x16xf32>
    %c1_i32_29 = arith.constant 1 : i32
    %87 = vector.broadcast %c1_i32_29 : i32 to vector<32x1xi32>
    %88 = arith.addi %37, %87 : vector<32x1xi32>
    %c0_i32_30 = arith.constant 0 : i32
    %89 = vector.broadcast %c0_i32_30 : i32 to vector<32x1xi32>
    %90 = arith.cmpi sge, %88, %89 : vector<32x1xi32>
    %c1_i32_31 = arith.constant 1 : i32
    %91 = vector.broadcast %c1_i32_31 : i32 to vector<32x1xi32>
    %92 = arith.addi %37, %91 : vector<32x1xi32>
    %c16_i32_32 = arith.constant 16 : i32
    %93 = vector.broadcast %c16_i32_32 : i32 to vector<32x1xi32>
    %94 = arith.cmpi slt, %92, %93 : vector<32x1xi32>
    %95 = arith.andi %90, %94 : vector<32x1xi1>
    %cst_33 = arith.constant 0.000000e+00 : f32
    %96 = vector.shape_cast %95 : vector<32x1xi1> to vector<32x1xi1>
    %97 = vector.broadcast %96 : vector<32x1xi1> to vector<32x16xi1>
    %98 = vector.broadcast %cst_33 : f32 to vector<32x16xf32>
    %99 = arith.select %97, %86, %98 : vector<32x16xi1>, vector<32x16xf32>
    %100 = tpu.concatenate %83, %67, %99 in 1 : vector<32x16xf32>, vector<32x16xf32>, vector<32x16xf32> -> vector<32x48xf32>
    %101 = arith.truncf %100 : vector<32x48xf32> to vector<32x48xbf16>
    %cst_34 = arith.constant dense<0.000000e+00> : vector<32x16xf32>
    %102 = tpu.matmul %101, %13, %cst_34 {dimension_numbers = #tpu.dot_dimension_numbers<[1], [0], [0], [1], [0, 0, 1, 1], [], []>} : vector<32x48xbf16>, vector<48x16xbf16>, vector<32x16xf32> -> vector<32x16xf32>
    %103 = vector.broadcast %4 : vector<1x16xf32> to vector<32x16xf32>
    %104 = arith.addf %102, %103 : vector<32x16xf32>
    %105 = arith.mulf %104, %104 : vector<32x16xf32>
    %106 = tpu.concatenate %104, %105 in 1 : vector<32x16xf32>, vector<32x16xf32> -> vector<32x32xf32>
    %cst_35 = arith.constant dense<0.000000e+00> : vector<32xf32>
    %107 = vector.multi_reduction <add>, %106, %cst_35 [0] : vector<32x32xf32> to vector<32xf32>
    %108 = vector.shape_cast %107 : vector<32xf32> to vector<1x32xf32>
    %cst_36 = arith.constant 3.200000e+01 : f32
    %109 = vector.broadcast %cst_36 : f32 to vector<1x32xf32>
    %110 = arith.divf %108, %109 : vector<1x32xf32>
    %111 = vector.extract_strided_slice %110 {offsets = [0, 0], sizes = [1, 16], strides = [1, 1]} : vector<1x32xf32> to vector<1x16xf32>
    %112 = vector.extract_strided_slice %110 {offsets = [0, 16], sizes = [1, 16], strides = [1, 1]} : vector<1x32xf32> to vector<1x16xf32>
    %113 = arith.mulf %111, %111 : vector<1x16xf32>
    %114 = arith.subf %112, %113 : vector<1x16xf32>
    %cst_37 = arith.constant 0.000000e+00 : f32
    %115 = vector.broadcast %cst_37 : f32 to vector<1x16xf32>
    %116 = arith.maximumf %114, %115 : vector<1x16xf32>
    %117 = vector.broadcast %111 : vector<1x16xf32> to vector<32x16xf32>
    %118 = arith.subf %104, %117 : vector<32x16xf32>
    %cst_38 = arith.constant 9.99999974E-6 : f32
    %119 = vector.broadcast %cst_38 : f32 to vector<1x16xf32>
    %120 = arith.addf %116, %119 : vector<1x16xf32>
    %121 = math.rsqrt %120 : vector<1x16xf32>
    %122 = vector.broadcast %121 : vector<1x16xf32> to vector<32x16xf32>
    %123 = arith.mulf %118, %122 : vector<32x16xf32>
    %124 = vector.broadcast %5 : vector<1x16xf32> to vector<32x16xf32>
    %125 = arith.mulf %123, %124 : vector<32x16xf32>
    %126 = vector.broadcast %6 : vector<1x16xf32> to vector<32x16xf32>
    %127 = arith.addf %125, %126 : vector<32x16xf32>
    %cst_39 = arith.constant 0.000000e+00 : f32
    %128 = vector.broadcast %cst_39 : f32 to vector<32x16xf32>
    %129 = arith.maximumf %127, %128 : vector<32x16xf32>
    %130 = vector.extract_strided_slice %129 {offsets = [30, 0], sizes = [2, 16], strides = [1, 1]} : vector<32x16xf32> to vector<2x16xf32>
    %131 = vector.extract_strided_slice %129 {offsets = [0, 0], sizes = [30, 16], strides = [1, 1]} : vector<32x16xf32> to vector<30x16xf32>
    %132 = tpu.concatenate %130, %131 in 0 : vector<2x16xf32>, vector<30x16xf32> -> vector<32x16xf32>
    %c-2_i32 = arith.constant -2 : i32
    %133 = vector.broadcast %c-2_i32 : i32 to vector<32x1xi32>
    %134 = arith.addi %37, %133 : vector<32x1xi32>
    %c0_i32_40 = arith.constant 0 : i32
    %135 = vector.broadcast %c0_i32_40 : i32 to vector<32x1xi32>
    %136 = arith.cmpi sge, %134, %135 : vector<32x1xi32>
    %c-2_i32_41 = arith.constant -2 : i32
    %137 = vector.broadcast %c-2_i32_41 : i32 to vector<32x1xi32>
    %138 = arith.addi %37, %137 : vector<32x1xi32>
    %c16_i32_42 = arith.constant 16 : i32
    %139 = vector.broadcast %c16_i32_42 : i32 to vector<32x1xi32>
    %140 = arith.cmpi slt, %138, %139 : vector<32x1xi32>
    %141 = arith.andi %136, %140 : vector<32x1xi1>
    %cst_43 = arith.constant 0.000000e+00 : f32
    %142 = vector.shape_cast %141 : vector<32x1xi1> to vector<32x1xi1>
    %143 = vector.broadcast %142 : vector<32x1xi1> to vector<32x16xi1>
    %144 = vector.broadcast %cst_43 : f32 to vector<32x16xf32>
    %145 = arith.select %143, %132, %144 : vector<32x16xi1>, vector<32x16xf32>
    %146 = vector.extract_strided_slice %129 {offsets = [31, 0], sizes = [1, 16], strides = [1, 1]} : vector<32x16xf32> to vector<1x16xf32>
    %147 = vector.extract_strided_slice %129 {offsets = [0, 0], sizes = [31, 16], strides = [1, 1]} : vector<32x16xf32> to vector<31x16xf32>
    %148 = tpu.concatenate %146, %147 in 0 : vector<1x16xf32>, vector<31x16xf32> -> vector<32x16xf32>
    %c-1_i32_44 = arith.constant -1 : i32
    %149 = vector.broadcast %c-1_i32_44 : i32 to vector<32x1xi32>
    %150 = arith.addi %37, %149 : vector<32x1xi32>
    %c0_i32_45 = arith.constant 0 : i32
    %151 = vector.broadcast %c0_i32_45 : i32 to vector<32x1xi32>
    %152 = arith.cmpi sge, %150, %151 : vector<32x1xi32>
    %c-1_i32_46 = arith.constant -1 : i32
    %153 = vector.broadcast %c-1_i32_46 : i32 to vector<32x1xi32>
    %154 = arith.addi %37, %153 : vector<32x1xi32>
    %c16_i32_47 = arith.constant 16 : i32
    %155 = vector.broadcast %c16_i32_47 : i32 to vector<32x1xi32>
    %156 = arith.cmpi slt, %154, %155 : vector<32x1xi32>
    %157 = arith.andi %152, %156 : vector<32x1xi1>
    %cst_48 = arith.constant 0.000000e+00 : f32
    %158 = vector.shape_cast %157 : vector<32x1xi1> to vector<32x1xi1>
    %159 = vector.broadcast %158 : vector<32x1xi1> to vector<32x16xi1>
    %160 = vector.broadcast %cst_48 : f32 to vector<32x16xf32>
    %161 = arith.select %159, %148, %160 : vector<32x16xi1>, vector<32x16xf32>
    %162 = vector.extract_strided_slice %129 {offsets = [1, 0], sizes = [31, 16], strides = [1, 1]} : vector<32x16xf32> to vector<31x16xf32>
    %163 = vector.extract_strided_slice %129 {offsets = [0, 0], sizes = [1, 16], strides = [1, 1]} : vector<32x16xf32> to vector<1x16xf32>
    %164 = tpu.concatenate %162, %163 in 0 : vector<31x16xf32>, vector<1x16xf32> -> vector<32x16xf32>
    %c1_i32_49 = arith.constant 1 : i32
    %165 = vector.broadcast %c1_i32_49 : i32 to vector<32x1xi32>
    %166 = arith.addi %37, %165 : vector<32x1xi32>
    %c0_i32_50 = arith.constant 0 : i32
    %167 = vector.broadcast %c0_i32_50 : i32 to vector<32x1xi32>
    %168 = arith.cmpi sge, %166, %167 : vector<32x1xi32>
    %c1_i32_51 = arith.constant 1 : i32
    %169 = vector.broadcast %c1_i32_51 : i32 to vector<32x1xi32>
    %170 = arith.addi %37, %169 : vector<32x1xi32>
    %c16_i32_52 = arith.constant 16 : i32
    %171 = vector.broadcast %c16_i32_52 : i32 to vector<32x1xi32>
    %172 = arith.cmpi slt, %170, %171 : vector<32x1xi32>
    %173 = arith.andi %168, %172 : vector<32x1xi1>
    %cst_53 = arith.constant 0.000000e+00 : f32
    %174 = vector.shape_cast %173 : vector<32x1xi1> to vector<32x1xi1>
    %175 = vector.broadcast %174 : vector<32x1xi1> to vector<32x16xi1>
    %176 = vector.broadcast %cst_53 : f32 to vector<32x16xf32>
    %177 = arith.select %175, %164, %176 : vector<32x16xi1>, vector<32x16xf32>
    %178 = vector.extract_strided_slice %129 {offsets = [2, 0], sizes = [30, 16], strides = [1, 1]} : vector<32x16xf32> to vector<30x16xf32>
    %179 = vector.extract_strided_slice %129 {offsets = [0, 0], sizes = [2, 16], strides = [1, 1]} : vector<32x16xf32> to vector<2x16xf32>
    %180 = tpu.concatenate %178, %179 in 0 : vector<30x16xf32>, vector<2x16xf32> -> vector<32x16xf32>
    %c2_i32 = arith.constant 2 : i32
    %181 = vector.broadcast %c2_i32 : i32 to vector<32x1xi32>
    %182 = arith.addi %37, %181 : vector<32x1xi32>
    %c0_i32_54 = arith.constant 0 : i32
    %183 = vector.broadcast %c0_i32_54 : i32 to vector<32x1xi32>
    %184 = arith.cmpi sge, %182, %183 : vector<32x1xi32>
    %c2_i32_55 = arith.constant 2 : i32
    %185 = vector.broadcast %c2_i32_55 : i32 to vector<32x1xi32>
    %186 = arith.addi %37, %185 : vector<32x1xi32>
    %c16_i32_56 = arith.constant 16 : i32
    %187 = vector.broadcast %c16_i32_56 : i32 to vector<32x1xi32>
    %188 = arith.cmpi slt, %186, %187 : vector<32x1xi32>
    %189 = arith.andi %184, %188 : vector<32x1xi1>
    %cst_57 = arith.constant 0.000000e+00 : f32
    %190 = vector.shape_cast %189 : vector<32x1xi1> to vector<32x1xi1>
    %191 = vector.broadcast %190 : vector<32x1xi1> to vector<32x16xi1>
    %192 = vector.broadcast %cst_57 : f32 to vector<32x16xf32>
    %193 = arith.select %191, %180, %192 : vector<32x16xi1>, vector<32x16xf32>
    %194 = tpu.concatenate %145, %161, %129, %177, %193 in 1 : vector<32x16xf32>, vector<32x16xf32>, vector<32x16xf32>, vector<32x16xf32>, vector<32x16xf32> -> vector<32x80xf32>
    %195 = arith.truncf %194 : vector<32x80xf32> to vector<32x80xbf16>
    %cst_58 = arith.constant dense<0.000000e+00> : vector<32x16xf32>
    %196 = tpu.matmul %195, %14, %cst_58 {dimension_numbers = #tpu.dot_dimension_numbers<[1], [0], [0], [1], [0, 0, 1, 1], [], []>} : vector<32x80xbf16>, vector<80x16xbf16>, vector<32x16xf32> -> vector<32x16xf32>
    %197 = vector.broadcast %7 : vector<1x16xf32> to vector<32x16xf32>
    %198 = arith.addf %196, %197 : vector<32x16xf32>
    %199 = arith.mulf %198, %198 : vector<32x16xf32>
    %200 = tpu.concatenate %198, %199 in 1 : vector<32x16xf32>, vector<32x16xf32> -> vector<32x32xf32>
    %cst_59 = arith.constant dense<0.000000e+00> : vector<32xf32>
    %201 = vector.multi_reduction <add>, %200, %cst_59 [0] : vector<32x32xf32> to vector<32xf32>
    %202 = vector.shape_cast %201 : vector<32xf32> to vector<1x32xf32>
    %cst_60 = arith.constant 3.200000e+01 : f32
    %203 = vector.broadcast %cst_60 : f32 to vector<1x32xf32>
    %204 = arith.divf %202, %203 : vector<1x32xf32>
    %205 = vector.extract_strided_slice %204 {offsets = [0, 0], sizes = [1, 16], strides = [1, 1]} : vector<1x32xf32> to vector<1x16xf32>
    %206 = vector.extract_strided_slice %204 {offsets = [0, 16], sizes = [1, 16], strides = [1, 1]} : vector<1x32xf32> to vector<1x16xf32>
    %207 = arith.mulf %205, %205 : vector<1x16xf32>
    %208 = arith.subf %206, %207 : vector<1x16xf32>
    %cst_61 = arith.constant 0.000000e+00 : f32
    %209 = vector.broadcast %cst_61 : f32 to vector<1x16xf32>
    %210 = arith.maximumf %208, %209 : vector<1x16xf32>
    %211 = vector.broadcast %205 : vector<1x16xf32> to vector<32x16xf32>
    %212 = arith.subf %198, %211 : vector<32x16xf32>
    %cst_62 = arith.constant 9.99999974E-6 : f32
    %213 = vector.broadcast %cst_62 : f32 to vector<1x16xf32>
    %214 = arith.addf %210, %213 : vector<1x16xf32>
    %215 = math.rsqrt %214 : vector<1x16xf32>
    %216 = vector.broadcast %215 : vector<1x16xf32> to vector<32x16xf32>
    %217 = arith.mulf %212, %216 : vector<32x16xf32>
    %218 = vector.broadcast %8 : vector<1x16xf32> to vector<32x16xf32>
    %219 = arith.mulf %217, %218 : vector<32x16xf32>
    %220 = vector.broadcast %9 : vector<1x16xf32> to vector<32x16xf32>
    %221 = arith.addf %219, %220 : vector<32x16xf32>
    %cst_63 = arith.constant 0.000000e+00 : f32
    %222 = vector.broadcast %cst_63 : f32 to vector<32x16xf32>
    %223 = arith.maximumf %221, %222 : vector<32x16xf32>
    %224 = arith.truncf %223 : vector<32x16xf32> to vector<32x16xbf16>
    %cst_64 = arith.constant dense<0.000000e+00> : vector<32x512xf32>
    %225 = tpu.matmul %224, %18, %cst_64 {dimension_numbers = #tpu.dot_dimension_numbers<[1], [0], [0], [1], [0, 0, 1, 1], [], []>} : vector<32x16xbf16>, vector<16x512xbf16>, vector<32x512xf32> -> vector<32x512xf32>
    %226 = arith.mulf %225, %20 : vector<32x512xf32>
    %227 = arith.truncf %226 : vector<32x512xf32> to vector<32x512xbf16>
    %cst_65 = arith.constant dense<0.000000e+00> : vector<8x512xf32>
    %228 = tpu.matmul %16, %227, %cst_65 {dimension_numbers = #tpu.dot_dimension_numbers<[1], [0], [0], [1], [0, 0, 1, 1], [], []>} : vector<8x32xbf16>, vector<32x512xbf16>, vector<8x512xf32> -> vector<8x512xf32>
    %229 = arith.truncf %228 : vector<8x512xf32> to vector<8x512xbf16>
    %cst_66 = arith.constant dense<0.000000e+00> : vector<8x32xf32>
    %230 = tpu.matmul %229, %17, %cst_66 {dimension_numbers = #tpu.dot_dimension_numbers<[1], [0], [0], [1], [0, 0, 1, 1], [], []>} : vector<8x512xbf16>, vector<512x32xbf16>, vector<8x32xf32> -> vector<8x32xf32>
    %231 = vector.broadcast %10 : vector<1x32xf32> to vector<8x32xf32>
    %232 = arith.addf %230, %231 : vector<8x32xf32>
    %cst_67 = arith.constant 0.000000e+00 : f32
    %233 = vector.broadcast %cst_67 : f32 to vector<8x32xf32>
    %234 = arith.maximumf %232, %233 : vector<8x32xf32>
    %235 = arith.truncf %234 : vector<8x32xf32> to vector<8x32xbf16>
    %cst_68 = arith.constant dense<0.000000e+00> : vector<8x128xf32>
    %236 = tpu.matmul %235, %15, %cst_68 {dimension_numbers = #tpu.dot_dimension_numbers<[1], [0], [0], [1], [0, 0, 1, 1], [], []>} : vector<8x32xbf16>, vector<32x128xbf16>, vector<8x128xf32> -> vector<8x128xf32>
    %237 = vector.broadcast %11 : vector<1x128xf32> to vector<8x128xf32>
    %238 = arith.addf %236, %237 : vector<8x128xf32>
    %c0_69 = arith.constant 0 : index
    %c0_70 = arith.constant 0 : index
    %239 = vector.load %arg4[%c0_69, %c0_70] : memref<8x128xf32, #tpu.memory_space<vmem>>, vector<8x128xf32>
    tpu.vector_store %arg4[%c0_69, %c0_70], %238 {strides = array<i32>} : memref<8x128xf32, #tpu.memory_space<vmem>>, vector<8x128xf32>,
    return
  }
}

</mosaic_0001>

<bundles_post_ra>
// kernel: cnn_forward.1
= control target key start
LH: loop header
LB: loop body
LE: loop exit
PB: predicated region body
PF: predicated region fallthrough
CT: control target
= control target key end

     0   :  { %vm206_vm0 = vcmask 1040384   ;;  %vm207_vm1 = vcmask 1041408   ;;  %v1881_v1 = vmov 65535   ;;  %vm199_vm2 = vcmask 23552   ;;  %s1883_s27 = smov 112   ;;  %s1884_s8 = smov 32   ;;  %s2370_s2 = inlined_call_operand.vmem [shape: bf16[704,128], index: 2, kind: input, shape index: {}]   ;;  %s2371_s0 = inlined_call_operand.vmem [shape: f32[32,3], index: 0, kind: input, shape index: {}]   ;;  %s2372_s1 = inlined_call_operand.vmem [shape: f32[32,128], index: 1, kind: input, shape index: {}]   ;;  %s2373_s3 = inlined_call_operand.vmem [shape: bf16[48,512], index: 3, kind: input, shape index: {}]   ;;  %s2374_s4 = inlined_call_operand.vmem [shape: f32[8,128], index: 4, kind: output, shape index: {}]  }
   0x1   :  { %v22_v0 = vld [vmem:[%s2370_s2] sm:$0x3]  ;;  %v208_v2 = vsel %vm206_vm0, 4294967295, %v1881_v1  ;;  %v190_v4 = vld [vmem:[%s2371_s0 + $0x8] sm:$0xff]  ;;  %v191_v7 = vld [vmem:[%s2371_s0 + $0x10] sm:$0xff]  ;;  %v136_v11 = vlaneseq  ;;  %vm282_vm3 = vcmask 130048  }
   0x2   :  { %v189_v3 = vld [vmem:[%s2371_s0] sm:$0xff]  ;;  %v209_v5 = vsel %vm207_vm1, %v208_v2, 0  ;;  %v192_v8 = vld [vmem:[%s2371_s0 + $0x18] sm:$0xff]  ;;  %s1882_s0 = smov 16   ;;  %vm287_vm4 = vcmask 261120   ;;  %vm393_vm5 = vcmask 1046528  }
   0x3   :  { %v193_v6 = vpack.c.bf16 %v190_v4, %v189_v3  ;;  %v211_v9 = vand.u32 %v209_v5, %v22_v0  ;;  %v194_v10 = vpack.c.bf16 %v192_v8, %v191_v7  ;;  %v1932_v12 = vshrl.u32 %v136_v11, 7  ;;  %v1940_v14 = vld [vmem:[%s2372_s1] sm:$0xff]  ;;  %v1827_v57 = vld [vmem:[%s2370_s2 + $0x18] sm:$0xff]   ;;  %v1828_v7 = vld [vmem:[%s2370_s2 + $0x10] sm:$0xff]   ;;  %s1885_s19 = smov 48   ;;  %s1886_s20 = smov 64  }
   0x4   :  { %1726 = vmatprep.subr.bf16.mxu1 %v1827_v57  ;;  %vm495_vm10 = vcmask 392192   ;;  %vm713_vm11 = vcmask 1045504  }
   0x5   :  { %1722 = vmatprep.mubr.msk.bf16.mxu0 %vm199_vm2, %v193_v6  ;;  %1720 = vmatprep.subr.bf16.mxu0 %v211_v9  ;;  %v1935_v13 = vsub.s32 0, %v1932_v12  ;;  %v330_v58 = vsub.s32 1, %v1932_v12  ;;  %v338_v59 = vsub.s32 2, %v1932_v12  ;;  %v1980_v60 = vadd.s32 24, %v1932_v12 }
   0x6   :  { %1721 = vmatpush3.bf16.msra.mxu0 %v211_v9  ;;  %1727 = vmatpush3.bf16.msra.mxu1 %v1827_v57  ;;  %v1983_v61 = vadd.s32 8, %v1932_v12 }
   0x7   :  { %v198_v15 = vrot.slane %v1940_v14, %v1935_v13  ;;  %v331_v2 = vrot.slane %v1940_v14, %v330_v58  ;;  %v339_v4 = vrot.slane %v1940_v14, %v338_v59  ;;  %v166_v5 = vand.u32 15, %v1980_v60  ;;  %1728 = vmatprep.subr.bf16.mxu1 %v1828_v7 }
   0x8   :  { %v152_v6 = vand.u32 15, %v1983_v61 }
   0x9   :  { %1723 = vmatmul.mubr.msk.bf16.vlgmr.msra.gmra.mxu0 %vm199_vm2, %v194_v10  ;;  %vm1889_vm2 = vmmov 0  }
   0xa   :  { %1729 = vmatpush3.bf16.msra.mxu1 %v1828_v7  ;;  %v728_v60 = vadd.s32 2, %v152_v6 }
   0xc   :  { %vm736_vm13 = vcmp.lt.s32.totalorder %v728_v60, 16 }
  0xc9   :  { %v1724_v16 = vpop.f32.mrf.mxu0 }
  0xca   :  { %v1944_v17 = vadd.f32 %v1724_v16, %v198_v15 }
  0xcb   :  { %v247_v18 = vpop.f32.mrf.mxu0 }
  0xcc   :  { %v1946_v19 = vadd.f32 %v247_v18, %v198_v15  ;;  %v264_v20 = vmul.f32 %v1944_v17, %v1944_v17 }
  0xcd   :  { %v1725_v21 = vpop.f32.mrf.mxu0 }
  0xce   :  { %v1950_v22 = vadd.f32 %v1725_v21, %v198_v15  ;;  %274 = vrot.lane.b32.xlu1 %v264_v20, %s1882_s0  ;;  %v262_v23 = vmul.f32 %v1946_v19, %v1946_v19  ;;  %v2001_v20 = vadd.s32 1, %v152_v6  ;;  %v1829_v21 = vld [vmem:[%s2370_s2 + $0x8] sm:$0xff]  }
  0xcf   :  { %v250_v24 = vpop.f32.mrf.mxu0  ;;  %1730 = vmatprep.subr.bf16.mxu1 %v1829_v21 }
  0xd0   :  { %v251_v25 = vadd.f32 %v250_v24, %v198_v15  ;;  %270 = vrot.lane.b32.xlu0 %v262_v23, %s1882_s0  ;;  %v265_v26 = vmul.f32 %v1950_v22, %v1950_v22  ;;  %1731 = vmatpush3.bf16.msra.mxu1 %v1829_v21  ;;  %vm416_vm7 = vcmp.lt.s32.totalorder %v2001_v20, 16 }
  0xd2   :  { %276 = vrot.lane.b32.xlu1 %v265_v26, %s1882_s0  ;;  %v263_v27 = vmul.f32 %v251_v25, %v251_v25 }
  0xd4   :  { %272 = vrot.lane.b32.xlu0 %v263_v27, %s1882_s0 }
 0x140   :  { %v275_v28 = vpop.permute.xlu1 %274 }
 0x141   :  { %v285_v33 = vsel %vm282_vm3, %v1944_v17, %v275_v28 }
 0x142   :  { %v271_v29 = vpop.permute.xlu0 %270  ;;  %v291_v39 = vsel %vm287_vm4, %v285_v33, 0.0 }
 0x143   :  { %v283_v30 = vsel %vm282_vm3, %v1946_v19, %v271_v29 }
 0x144   :  { %v277_v31 = vpop.permute.xlu1 %276  ;;  %v288_v35 = vsel %vm287_vm4, %v283_v30, 0.0 }
 0x145   :  { %v286_v37 = vsel %vm282_vm3, %v1950_v22, %v277_v31 }
 0x146   :  { %v273_v32 = vpop.permute.xlu0 %272  ;;  %v293_v41 = vsel %vm287_vm4, %v286_v37, 0.0 }
 0x147   :  { %v284_v34 = vsel %vm282_vm3, %v251_v25, %v273_v32 }
 0x148   :  { %v289_v36 = vsel %vm287_vm4, %v284_v34, 0.0 }
 0x149   :  { %v290_v38 = vadd.f32 %v289_v36, %v288_v35 }
 0x14b   :  { %v292_v40 = vadd.f32 %v291_v39, %v290_v38 }
 0x14d   :  { %v294_v42 = vadd.f32 %v293_v41, %v292_v40 }
 0x14f   :  { %v295_v43 = vrot.slane %v294_v42, 4 }
 0x151   :  { %v296_v44 = vadd.f32 %v295_v43, %v294_v42 }
 0x153   :  { %v297_v45 = vrot.slane %v296_v44, 2 }
 0x155   :  { %v298_v46 = vadd.f32 %v297_v45, %v296_v44 }
 0x157   :  { %v299_v47 = vrot.slane %v298_v46, 1 }
 0x159   :  { %v300_v48 = vadd.f32 %v299_v47, %v298_v46 }
 0x15b   :  { %v302_v49 = vmul.f32 0.03125, %v300_v48 }
 0x15d   :  { %v303_v50 = vmul.f32 %v302_v49, %v302_v49  ;;  %v310_v62 = vsub.f32 %v1946_v19, %v302_v49  ;;  %v311_v63 = vsub.f32 %v251_v25, %v302_v49  ;;  %v312_v0 = vsub.f32 %v1944_v17, %v302_v49 }
 0x15e   :  { %v313_v1 = vsub.f32 %v1950_v22, %v302_v49  ;;  %v1997_v19 = vadd.s32 1, %v166_v5 }
 0x15f   :  { %305 = vrot.lane.b32.xlu0 %v303_v50, %s1882_s0 }
 0x160   :  { %vm418_vm6 = vcmp.lt.s32.totalorder %v1997_v19, 16 }
 0x1d1   :  { %v306_v51 = vpop.permute.xlu0 %305 }
 0x1d2   :  { %v308_v52 = vsub.f32 %v302_v49, %v306_v51 }
 0x1d4   :  { %v309_v53 = vmax.f32 %v308_v52, 0.0  ;;  %v2025_v52 = vadd.s32 16, %v1932_v12 }
 0x1d6   :  { %v314_v54 = vadd.f32 1e-05, %v309_v53  ;;  %v159_v53 = vand.u32 15, %v2025_v52 }
 0x1d8   :  { %1875 = vrsqrt.f32 %v314_v54  ;;  %v145_v54 = vand.u32 15, %v1932_v12 }
 0x1e5   :  { %v1876_v55 = vpop.eup %1875 }
 0x1e6   :  { %v319_v56 = vrot.slane %v1876_v55, %v1935_v13  ;;  %v2031_v55 = vadd.s32 4294967295, %v159_v53 }
 0x1e8   :  { %321 = vrot.lane.b32.xlu1 %v319_v56, %s1883_s27  ;;  %v2035_v56 = vadd.s32 4294967295, %v145_v54  ;;  %vm371_vm8 = vcmp.ge.s32.totalorder %v2031_v55, 0  ;;  %v1834_v55 = vld [vmem:[%s2370_s2 + $0x20] sm:$0xff]  }
 0x1ea   :  { %vm369_vm9 = vcmp.ge.s32.totalorder %v2035_v56, 0 }
 0x25a   :  { %v322_v3 = vpop.permute.xlu1 %321 }
 0x25b   :  { %v324_v8 = vmul.f32 %v322_v3, %v310_v62  ;;  %v325_v9 = vmul.f32 %v322_v3, %v311_v63  ;;  %v326_v10 = vmul.f32 %v322_v3, %v312_v0  ;;  %v327_v11 = vmul.f32 %v322_v3, %v313_v1 }
 0x25d   :  { %v332_v15 = vmul.f32 %v331_v2, %v324_v8  ;;  %v333_v16 = vmul.f32 %v331_v2, %v325_v9  ;;  %v334_v17 = vmul.f32 %v331_v2, %v326_v10  ;;  %v335_v18 = vmul.f32 %v331_v2, %v327_v11 }
 0x25f   :  { %v342_v22 = vadd.f32 %v339_v4, %v334_v17  ;;  %v343_v23 = vadd.f32 %v339_v4, %v335_v18  ;;  %v340_v24 = vadd.f32 %v339_v4, %v332_v15  ;;  %v341_v25 = vadd.f32 %v339_v4, %v333_v16 }
 0x261   :  { %v346_v26 = vmax.f32 %v342_v22, 0.0  ;;  %v347_v27 = vmax.f32 %v343_v23, 0.0  ;;  %v344_v28 = vmax.f32 %v340_v24, 0.0  ;;  %v345_v29 = vmax.f32 %v341_v25, 0.0 }
 0x263   :  { %v1772_v30 = vpack.i.bf16 %v347_v27, %v346_v26  ;;  %v355_v31 = vrot.slane %v345_v29, 7  ;;  %v1767_v32 = vpack.i.bf16 %v345_v29, %v344_v28  ;;  %v394_v33 = vrot.slane %v344_v28, 1 }
 0x264   :  { %v397_v34 = vrot.slane %v346_v26, 1  ;;  %v399_v35 = vrot.slane %v347_v27, 1  ;;  %v395_v36 = vrot.slane %v345_v29, 1  ;;  %v349_v37 = vrot.slane %v347_v27, 7 }
 0x265   :  { %1773 = vrot.lane.b32.xlu1 %v1772_v30, %s1882_s0  ;;  %1768 = vrot.lane.b32.xlu0 %v1767_v32, %s1882_s0  ;;  %v357_v38 = vrot.slane %v346_v26, 7  ;;  %v354_v39 = vrot.slane %v344_v28, 7  ;;  %v475_v26 = vsub.s32 3, %v1932_v12 }
 0x266   :  { %v400_v40 = vsel %vm393_vm5, %v397_v34, %v399_v35  ;;  %v406_v41 = vsel %vm393_vm5, %v399_v35, %v394_v33  ;;  %v396_v42 = vsel %vm393_vm5, %v394_v33, %v395_v36  ;;  %v398_v43 = vsel %vm393_vm5, %v395_v36, %v397_v34 }
 0x267   :  { %v434_v44 = vsel %vm418_vm6, %v406_v41, 0.0  ;;  %v432_v45 = vsel %vm416_vm7, %v398_v43, 0.0  ;;  %v358_v46 = vsel %vm206_vm0, %v355_v31, %v357_v38  ;;  %v359_v47 = vsel %vm206_vm0, %v357_v38, %v349_v37 }
 0x268   :  { %v1782_v48 = vpack.i.bf16 %v434_v44, %v400_v40  ;;  %v1777_v49 = vpack.i.bf16 %v432_v45, %v396_v42  ;;  %v356_v50 = vsel %vm206_vm0, %v354_v39, %v355_v31  ;;  %v364_v51 = vsel %vm206_vm0, %v349_v37, %v354_v39 }
 0x269   :  { %v391_v1 = vsel %vm371_vm8, %v358_v46, 0.0  ;;  %v389_v4 = vsel %vm369_vm9, %v364_v51, 0.0  ;;  %v476_v28 = vrot.slane %v1940_v14, %v475_v26 }
 0x26a   :  { %1783 = vrot.lane.b32.xlu1 %v1782_v48, %s1884_s8  ;;  %1778 = vrot.lane.b32.xlu0 %v1777_v49, %s1884_s8 }
 0x2d7   :  { %v1774_v57 = vpop.permute.xlu1 %1773  ;;  %v1769_v58 = vpop.permute.xlu0 %1768 }
 0x2d8   :  { %v1776_v59 = vunpack.i.h.bf16 %v1774_v57  ;;  %v1775_v62 = vunpack.i.l.bf16 %v1774_v57  ;;  %v1771_v63 = vunpack.i.h.bf16 %v1769_v58  ;;  %v1770_v0 = vunpack.i.l.bf16 %v1769_v58 }
 0x2da   :  { %v465_v11 = vsel %vm282_vm3, %v391_v1, %v1775_v62  ;;  %v466_v15 = vsel %vm282_vm3, %v359_v47, %v1776_v59  ;;  %v463_v16 = vsel %vm282_vm3, %v389_v4, %v1770_v0  ;;  %v464_v17 = vsel %vm282_vm3, %v356_v50, %v1771_v63 }
 0x2dc   :  { %v1784_v2 = vpop.permute.xlu1 %1783  ;;  %v1779_v3 = vpop.permute.xlu0 %1778 }
 0x2dd   :  { %v1786_v7 = vunpack.i.h.bf16 %v1784_v2  ;;  %v1785_v8 = vunpack.i.l.bf16 %v1784_v2  ;;  %v1781_v9 = vunpack.i.h.bf16 %v1779_v3  ;;  %v1780_v10 = vunpack.i.l.bf16 %v1779_v3 }
 0x2df   :  { %v470_v18 = vsel %vm287_vm4, %v466_v15, %v1786_v7  ;;  %v469_v21 = vsel %vm287_vm4, %v465_v11, %v1785_v8  ;;  %v467_v22 = vsel %vm287_vm4, %v463_v16, %v1780_v10  ;;  %v468_v23 = vsel %vm287_vm4, %v464_v17, %v1781_v9  ;;  %v1830_v17 = vld [vmem:[%s2370_s2 + $0x40] sm:$0xff]  }
 0x2e0   :  { %v472_v24 = vpack.c.bf16 %v470_v18, %v469_v21  ;;  %v471_v25 = vpack.c.bf16 %v468_v23, %v467_v22  ;;  %1736 = vmatprep.subr.bf16.mxu0 %v1830_v17  ;;  %v616_v18 = vsub.s32 4, %v1932_v12  ;;  %v624_v21 = vsub.s32 5, %v1932_v12  ;;  %v1831_v23 = vld [vmem:[%s2370_s2 + $0x38] sm:$0xff]  }
 0x2e1   :  { %1737 = vmatpush3.bf16.msra.mxu0 %v1830_v17 }
 0x2e2   :  { %1732 = vmatprep.mubr.msk.bf16.mxu1 %vm495_vm10, %v471_v25  ;;  %1738 = vmatprep.subr.bf16.mxu0 %v1831_v23 }
 0x2e3   :  { %1733 = vmatmul.mubr.msk.bf16.vlgmr.msra.gmra.mxu1 %vm495_vm10, %v472_v24 }
 0x2e5   :  { %1739 = vmatpush3.bf16.msra.mxu0 %v1831_v23 }
 0x3a3   :  { %v1734_v27 = vpop.f32.mrf.mxu1 }
 0x3a4   :  { %v545_v32 = vadd.f32 %v1734_v27, %v476_v28  ;;  %v617_v27 = vrot.slane %v1940_v14, %v616_v18 }
 0x3a5   :  { %v536_v29 = vpop.f32.mrf.mxu1 }
 0x3a6   :  { %v537_v30 = vadd.f32 %v536_v29, %v476_v28  ;;  %v553_v38 = vmul.f32 %v545_v32, %v545_v32 }
 0x3a7   :  { %v1735_v31 = vpop.f32.mrf.mxu1 }
 0x3a8   :  { %v551_v33 = vmul.f32 %v537_v30, %v537_v30  ;;  %v548_v36 = vadd.f32 %v1735_v31, %v476_v28 }
 0x3a9   :  { %v539_v34 = vpop.f32.mrf.mxu1 }
 0x3aa   :  { %v540_v35 = vadd.f32 %v539_v34, %v476_v28  ;;  %559 = vrot.lane.b32.xlu0 %v551_v33, %s1882_s0  ;;  %v554_v39 = vmul.f32 %v548_v36, %v548_v36  ;;  %v625_v28 = vrot.slane %v1940_v14, %v624_v21 }
 0x3ac   :  { %v552_v37 = vmul.f32 %v540_v35, %v540_v35 }
 0x3ae   :  { %561 = vrot.lane.b32.xlu1 %v552_v37, %s1882_s0  ;;  %563 = vrot.lane.b32.xlu0 %v553_v38, %s1882_s0 }
 0x3b2   :  { %565 = vrot.lane.b32.xlu1 %v554_v39, %s1882_s0 }
 0x41c   :  { %v560_v40 = vpop.permute.xlu0 %559 }
 0x41d   :  { %v571_v41 = vsel %vm282_vm3, %v537_v30, %v560_v40 }
 0x41e   :  { %v575_v46 = vsel %vm287_vm4, %v571_v41, 0.0 }
 0x420   :  { %v562_v42 = vpop.permute.xlu1 %561  ;;  %v564_v43 = vpop.permute.xlu0 %563 }
 0x421   :  { %v572_v44 = vsel %vm282_vm3, %v540_v35, %v562_v42  ;;  %v573_v45 = vsel %vm282_vm3, %v545_v32, %v564_v43  ;;  %v1832_v43 = vld [vmem:[%s2370_s2 + $0x30] sm:$0xff]  }
 0x422   :  { %v576_v47 = vsel %vm287_vm4, %v572_v44, 0.0  ;;  %v578_v49 = vsel %vm287_vm4, %v573_v45, 0.0  ;;  %1740 = vmatprep.subr.bf16.mxu0 %v1832_v43 }
 0x423   :  { %v577_v48 = vadd.f32 %v576_v47, %v575_v46  ;;  %1741 = vmatpush3.bf16.msra.mxu0 %v1832_v43 }
 0x424   :  { %v566_v50 = vpop.permute.xlu1 %565 }
 0x425   :  { %v579_v51 = vadd.f32 %v578_v49, %v577_v48  ;;  %v574_v57 = vsel %vm282_vm3, %v548_v36, %v566_v50 }
 0x426   :  { %v580_v58 = vsel %vm287_vm4, %v574_v57, 0.0 }
 0x427   :  { %v581_v59 = vadd.f32 %v580_v58, %v579_v51  ;;  %v1833_v51 = vld [vmem:[%s2370_s2 + $0x28] sm:$0xff]  }
 0x428   :  { %1742 = vmatprep.subr.bf16.mxu0 %v1833_v51 }
 0x429   :  { %v582_v62 = vrot.slane %v581_v59, 4  ;;  %1743 = vmatpush3.bf16.msra.mxu0 %v1833_v51 }
 0x42a   :  { %1744 = vmatprep.subr.bf16.mxu0 %v1834_v55 }
 0x42b   :  { %v583_v63 = vadd.f32 %v582_v62, %v581_v59 }
 0x42d   :  { %v584_v0 = vrot.slane %v583_v63, 2  ;;  %1745 = vmatpush3.bf16.msra.mxu0 %v1834_v55 }
 0x42f   :  { %v585_v1 = vadd.f32 %v584_v0, %v583_v63 }
 0x431   :  { %v586_v2 = vrot.slane %v585_v1, 1 }
 0x433   :  { %v587_v3 = vadd.f32 %v586_v2, %v585_v1 }
 0x435   :  { %v588_v4 = vmul.f32 0.03125, %v587_v3 }
 0x437   :  { %v589_v7 = vmul.f32 %v588_v4, %v588_v4  ;;  %v596_v22 = vsub.f32 %v537_v30, %v588_v4  ;;  %v597_v24 = vsub.f32 %v540_v35, %v588_v4  ;;  %v598_v25 = vsub.f32 %v545_v32, %v588_v4 }
 0x438   :  { %v599_v26 = vsub.f32 %v548_v36, %v588_v4  ;;  %v2082_v35 = vadd.s32 2, %v166_v5 }
 0x439   :  { %591 = vrot.lane.b32.xlu0 %v589_v7, %s1882_s0 }
 0x43a   :  { %vm738_vm12 = vcmp.lt.s32.totalorder %v2082_v35, 16 }
 0x4ab   :  { %v592_v8 = vpop.permute.xlu0 %591 }
 0x4ac   :  { %v594_v9 = vsub.f32 %v588_v4, %v592_v8 }
 0x4ae   :  { %v595_v10 = vmax.f32 %v594_v9, 0.0 }
 0x4b0   :  { %v600_v11 = vadd.f32 1e-05, %v595_v10 }
 0x4b2   :  { %1877 = vrsqrt.f32 %v600_v11 }
 0x4bf   :  { %v1878_v15 = vpop.eup %1877 }
 0x4c0   :  { %v605_v16 = vrot.slane %v1878_v15, %v1935_v13 }
 0x4c2   :  { %607 = vrot.lane.b32.xlu1 %v605_v16, %s1883_s27 }
 0x534   :  { %v608_v29 = vpop.permute.xlu1 %607 }
 0x535   :  { %v610_v31 = vmul.f32 %v608_v29, %v596_v22  ;;  %v611_v33 = vmul.f32 %v608_v29, %v597_v24  ;;  %v612_v34 = vmul.f32 %v608_v29, %v598_v25  ;;  %v613_v37 = vmul.f32 %v608_v29, %v599_v26 }
 0x537   :  { %v618_v38 = vmul.f32 %v617_v27, %v610_v31  ;;  %v619_v30 = vmul.f32 %v617_v27, %v611_v33  ;;  %v620_v39 = vmul.f32 %v617_v27, %v612_v34  ;;  %v621_v40 = vmul.f32 %v617_v27, %v613_v37 }
 0x539   :  { %v626_v32 = vadd.f32 %v625_v28, %v618_v38  ;;  %v627_v36 = vadd.f32 %v625_v28, %v619_v30  ;;  %v628_v41 = vadd.f32 %v625_v28, %v620_v39  ;;  %v629_v42 = vadd.f32 %v625_v28, %v621_v40 }
 0x53b   :  { %v2087_v44 = vmax.f32 %v626_v32, 0.0  ;;  %v2089_v45 = vmax.f32 %v627_v36, 0.0  ;;  %v632_v46 = vmax.f32 %v628_v41, 0.0  ;;  %v2091_v47 = vmax.f32 %v629_v42, 0.0 }
 0x53c   :  { %v653_v41 = vadd.s32 4294967294, %v159_v53  ;;  %v651_v42 = vadd.s32 4294967294, %v145_v54 }
 0x53d   :  { %v1792_v5 = vpack.i.bf16 %v2091_v47, %v632_v46  ;;  %v1787_v48 = vpack.i.bf16 %v2089_v45, %v2087_v44  ;;  %v679_v49 = vrot.slane %v2091_v47, 7  ;;  %v682_v50 = vrot.slane %v2089_v45, 7 }
 0x53e   :  { %v684_v57 = vrot.slane %v632_v46, 7  ;;  %v681_v58 = vrot.slane %v2087_v44, 7  ;;  %v696_v61 = vrot.slane %v2087_v44, 1  ;;  %v699_v6 = vrot.slane %v632_v46, 1 }
 0x53f   :  { %1793 = vrot.lane.b32.xlu1 %v1792_v5, %s1884_s8  ;;  %1788 = vrot.lane.b32.xlu0 %v1787_v48, %s1884_s8  ;;  %v701_v59 = vrot.slane %v2091_v47, 1  ;;  %v697_v62 = vrot.slane %v2089_v45, 1  ;;  %v714_v63 = vrot.slane %v2087_v44, 2  ;;  %v717_v0 = vrot.slane %v632_v46, 2 }
 0x540   :  { %v685_v1 = vsel %vm206_vm0, %v682_v50, %v684_v57  ;;  %v686_v2 = vsel %vm206_vm0, %v684_v57, %v679_v49  ;;  %v683_v3 = vsel %vm206_vm0, %v681_v58, %v682_v50  ;;  %v691_v4 = vsel %vm206_vm0, %v679_v49, %v681_v58 }
 0x541   :  { %v694_v7 = vsel %vm371_vm8, %v685_v1, 0.0  ;;  %v692_v8 = vsel %vm369_vm9, %v691_v4, 0.0  ;;  %v702_v9 = vsel %vm393_vm5, %v699_v6, %v701_v59  ;;  %v708_v10 = vsel %vm393_vm5, %v701_v59, %v696_v61 }
 0x542   :  { %v1802_v11 = vpack.i.bf16 %v686_v2, %v694_v7  ;;  %v1797_v15 = vpack.i.bf16 %v683_v3, %v692_v8  ;;  %v712_v16 = vsel %vm418_vm6, %v708_v10, 0.0  ;;  %v698_v17 = vsel %vm393_vm5, %v696_v61, %v697_v62 }
 0x543   :  { %v700_v18 = vsel %vm393_vm5, %v697_v62, %v699_v6  ;;  %v719_v56 = vrot.slane %v2091_v47, 2  ;;  %v715_v21 = vrot.slane %v2089_v45, 2  ;;  %v635_v22 = vrot.slane %v2091_v47, 6 }
 0x544   :  { %1803 = vrot.lane.b32.xlu1 %v1802_v11, %s1882_s0  ;;  %1798 = vrot.lane.b32.xlu0 %v1797_v15, %s1882_s0  ;;  %v710_v19 = vsel %vm416_vm7, %v700_v18, 0.0  ;;  %v643_v23 = vrot.slane %v632_v46, 6  ;;  %v641_v24 = vrot.slane %v2089_v45, 6  ;;  %v1812_v25 = vpack.i.bf16 %v712_v16, %v702_v9 }
 0x545   :  { %v1807_v26 = vpack.i.bf16 %v710_v19, %v698_v17  ;;  %v726_v27 = vsel %vm713_vm11, %v719_v56, %v714_v63  ;;  %v720_v28 = vsel %vm713_vm11, %v717_v0, %v719_v56  ;;  %v718_v29 = vsel %vm713_vm11, %v715_v21, %v717_v0 }
 0x546   :  { %v645_v31 = vsel %vm207_vm1, %v643_v23, %v635_v22  ;;  %v644_v33 = vsel %vm207_vm1, %v641_v24, %v643_v23  ;;  %v754_v20 = vsel %vm738_vm12, %v726_v27, 0.0  ;;  %v716_v34 = vsel %vm713_vm11, %v714_v63, %v715_v21 }
 0x547   :  { %v752_v37 = vsel %vm736_vm13, %v718_v29, 0.0  ;;  %v640_v38 = vrot.slane %v2087_v44, 6  ;;  %v1822_v40 = vpack.i.bf16 %v754_v20, %v720_v28  ;;  %vm657_vm14 = vcmp.ge.s32.totalorder %v653_v41, 0 }
 0x548   :  { %1813 = vrot.lane.b32.xlu1 %v1812_v25, %s1885_s19  ;;  %1808 = vrot.lane.b32.xlu0 %v1807_v26, %s1885_s19  ;;  %v1817_v32 = vpack.i.bf16 %v752_v37, %v716_v34  ;;  %vm655_vm15 = vcmp.ge.s32.totalorder %v651_v42, 0  ;;  %v677_v5 = vsel %vm657_vm14, %v644_v33, 0.0  ;;  %vm827_vm0 = vcmask 523264  }
 0x549   :  { %v642_v30 = vsel %vm207_vm1, %v640_v38, %v641_v24  ;;  %v650_v39 = vsel %vm207_vm1, %v635_v22, %v640_v38  ;;  %vm868_vm1 = vcmask 654336   ;;  %v836_v25 = vsub.s32 6, %v1932_v12 }
 0x54a   :  { %v675_v48 = vsel %vm655_vm15, %v650_v39, 0.0 }
 0x54b   :  { %v837_v27 = vrot.slane %v1940_v14, %v836_v25 }
 0x54c   :  { %1823 = vrot.lane.b32.xlu1 %v1822_v40, %s1886_s20  ;;  %1818 = vrot.lane.b32.xlu0 %v1817_v32, %s1886_s20 }
 0x5b1   :  { %v1794_v35 = vpop.permute.xlu1 %1793  ;;  %v1789_v36 = vpop.permute.xlu0 %1788 }
 0x5b2   :  { %v1796_v49 = vunpack.i.h.bf16 %v1794_v35  ;;  %v1795_v50 = vunpack.i.l.bf16 %v1794_v35  ;;  %v1791_v51 = vunpack.i.h.bf16 %v1789_v36  ;;  %v1790_v57 = vunpack.i.l.bf16 %v1789_v36 }
 0x5b6   :  { %v1804_v43 = vpop.permute.xlu1 %1803  ;;  %v1799_v44 = vpop.permute.xlu0 %1798 }
 0x5b7   :  { %v1806_v45 = vunpack.i.h.bf16 %v1804_v43  ;;  %v1805_v46 = vunpack.i.l.bf16 %v1804_v43  ;;  %v1801_v47 = vunpack.i.h.bf16 %v1799_v44  ;;  %v1800_v60 = vunpack.i.l.bf16 %v1799_v44 }
 0x5b9   :  { %v818_v53 = vsel %vm282_vm3, %v645_v31, %v1806_v45  ;;  %v817_v54 = vsel %vm282_vm3, %v677_v5, %v1805_v46  ;;  %v815_v61 = vsel %vm282_vm3, %v675_v48, %v1800_v60  ;;  %v816_v6 = vsel %vm282_vm3, %v642_v30, %v1801_v47 }
 0x5ba   :  { %v1814_v58 = vpop.permute.xlu1 %1813  ;;  %v1809_v52 = vpop.permute.xlu0 %1808  ;;  %v821_v1 = vsel %vm287_vm4, %v817_v54, %v1795_v50  ;;  %v822_v2 = vsel %vm287_vm4, %v818_v53, %v1796_v49  ;;  %v819_v3 = vsel %vm287_vm4, %v815_v61, %v1790_v57  ;;  %v820_v4 = vsel %vm287_vm4, %v816_v6, %v1791_v51 }
 0x5bb   :  { %v1816_v59 = vunpack.i.h.bf16 %v1814_v58  ;;  %v1815_v62 = vunpack.i.l.bf16 %v1814_v58  ;;  %v1811_v63 = vunpack.i.h.bf16 %v1809_v52  ;;  %v1810_v0 = vunpack.i.l.bf16 %v1809_v52 }
 0x5bd   :  { %v826_v16 = vsel %vm495_vm10, %v822_v2, %v1816_v59  ;;  %v825_v17 = vsel %vm495_vm10, %v821_v1, %v1815_v62  ;;  %v823_v55 = vsel %vm495_vm10, %v819_v3, %v1810_v0  ;;  %v824_v18 = vsel %vm495_vm10, %v820_v4, %v1811_v63  ;;  %v1835_v1 = vld [vmem:[%s2373_s3] ss:$16 sps:$4 sm:$0xff]   ;;  %v1837_v4 = vld [vmem:[%s2373_s3 + $0x4] ss:$16 sps:$4 sm:$0xff]  }
 0x5be   :  { %v1824_v7 = vpop.permute.xlu1 %1823  ;;  %v1819_v8 = vpop.permute.xlu0 %1818  ;;  %v1887_v2 = vmov 0   ;;  %1049 = vmatprep.subr.bf16.mxu1 %v1837_v4  ;;  %v112_v4 = vld [vmem:[%s2373_s3 + $0x20] sm:$0xff] }
 0x5bf   :  { %v1826_v9 = vunpack.i.h.bf16 %v1824_v7  ;;  %v1825_v10 = vunpack.i.l.bf16 %v1824_v7  ;;  %v1821_v11 = vunpack.i.h.bf16 %v1819_v8  ;;  %v1820_v15 = vunpack.i.l.bf16 %v1819_v8  ;;  %1067 = vmatprep.mubr.bf16.mxu1 %v1887_v2  ;;  %v1838_v8 = vld [vmem:[%s2373_s3 + $0x8] ss:$16 sps:$4 sm:$0xff]   ;;  %1050 = vmatpush1.bf16.msra.mxu1 %v1835_v1 }
 0x5c1   :  { %v830_v56 = vsel %vm827_vm0, %v825_v17, %v1825_v10  ;;  %v831_v21 = vsel %vm827_vm0, %v826_v16, %v1826_v9  ;;  %v828_v19 = vsel %vm827_vm0, %v823_v55, %v1820_v15  ;;  %v829_v22 = vsel %vm827_vm0, %v824_v18, %v1821_v11  ;;  %v1840_v9 = vld [vmem:[%s2373_s3 + $0xc] ss:$16 sps:$4 sm:$0xff]  }
 0x5c2   :  { %v833_v23 = vpack.c.bf16 %v831_v21, %v830_v56  ;;  %v832_v24 = vpack.c.bf16 %v829_v22, %v828_v19  ;;  %1102 = vmatprep.subr.bf16.mxu0 %v1840_v9  ;;  %v989_v10 = vsub.s32 7, %v1932_v12  ;;  %v1610_v22 = vld [vmem:[%s2372_s1 + $0x8] ss:$0 sm:$0xff] }
 0x5c4   :  { %1746 = vmatprep.mubr.msk.bf16.mxu0 %vm868_vm1, %v832_v24  ;;  %v990_v17 = vrot.slane %v1940_v14, %v989_v10  ;;  %v121_v10 = vunpack.c.h.bf16 %v112_v4 }
 0x5c5   :  { %1747 = vmatmul.mubr.msk.bf16.vlgmr.msra.gmra.mxu0 %vm868_vm1, %v833_v23 }
 0x5c6   :  { %1120 = vmatprep.mubr.bf16.mxu0 %v1887_v2  ;;  %1103 = vmatpush1.bf16.msra.mxu0 %v1838_v8 }
 0x685   :  { %v1748_v26 = vpop.f32.mrf.mxu0 }
 0x686   :  { %v2174_v33 = vadd.f32 %v1748_v26, %v837_v27 }
 0x687   :  { %v909_v28 = vpop.f32.mrf.mxu0 }
 0x688   :  { %v2172_v29 = vadd.f32 %v909_v28, %v837_v27  ;;  %v926_v39 = vmul.f32 %v2174_v33, %v2174_v33 }
 0x689   :  { %v1749_v31 = vpop.f32.mrf.mxu0 }
 0x68a   :  { %v924_v20 = vmul.f32 %v2172_v29, %v2172_v29  ;;  %v921_v38 = vadd.f32 %v1749_v31, %v837_v27 }
 0x68b   :  { %v912_v34 = vpop.f32.mrf.mxu0 }
 0x68c   :  { %v913_v37 = vadd.f32 %v912_v34, %v837_v27  ;;  %932 = vrot.lane.b32.xlu0 %v924_v20, %s1882_s0  ;;  %v927_v40 = vmul.f32 %v921_v38, %v921_v38 }
 0x68e   :  { %v925_v30 = vmul.f32 %v913_v37, %v913_v37 }
 0x690   :  { %934 = vrot.lane.b32.xlu1 %v925_v30, %s1882_s0  ;;  %936 = vrot.lane.b32.xlu0 %v926_v39, %s1882_s0  ;;  %v1842_v30 = vld [vmem:[%s2370_s2 + $0x98] sm:$0xff]   ;;  %v1843_v39 = vld [vmem:[%s2370_s2 + $0xd0] sm:$0xff]  }
 0x694   :  { %938 = vrot.lane.b32.xlu1 %v927_v40, %s1882_s0  ;;  %v1844_v40 = vld [vmem:[%s2370_s2 + $0x90] sm:$0xff]  }
 0x6fe   :  { %v933_v32 = vpop.permute.xlu0 %932 }
 0x6ff   :  { %v944_v35 = vsel %vm282_vm3, %v2172_v29, %v933_v32  ;;  %v1845_v32 = vld [vmem:[%s2370_s2 + $0xc8] sm:$0xff]  }
 0x700   :  { %v948_v44 = vsel %vm287_vm4, %v944_v35, 0.0  ;;  %v1847_v35 = vld [vmem:[%s2370_s2 + $0x88] sm:$0xff]  }
 0x702   :  { %v935_v36 = vpop.permute.xlu1 %934  ;;  %v937_v41 = vpop.permute.xlu0 %936 }
 0x703   :  { %v945_v42 = vsel %vm282_vm3, %v913_v37, %v935_v36  ;;  %v946_v43 = vsel %vm282_vm3, %v2174_v33, %v937_v41  ;;  %v1849_v36 = vld [vmem:[%s2370_s2 + $0xc0] sm:$0xff]  }
 0x704   :  { %v949_v45 = vsel %vm287_vm4, %v945_v42, 0.0  ;;  %v951_v47 = vsel %vm287_vm4, %v946_v43, 0.0  ;;  %v1851_v41 = vld [vmem:[%s2370_s2 + $0x80] sm:$0xff]   ;;  %v1853_v42 = vld [vmem:[%s2370_s2 + $0xb8] sm:$0xff]  }
 0x705   :  { %v950_v46 = vadd.f32 %v949_v45, %v948_v44  ;;  %v1855_v43 = vld [vmem:[%s2370_s2 + $0x78] sm:$0xff]   ;;  %v1857_v44 = vld [vmem:[%s2370_s2 + $0xb0] sm:$0xff]  }
 0x706   :  { %v939_v60 = vpop.permute.xlu1 %938  ;;  %v1859_v45 = vld [vmem:[%s2370_s2 + $0x70] sm:$0xff]  }
 0x707   :  { %v952_v5 = vadd.f32 %v951_v47, %v950_v46  ;;  %v947_v48 = vsel %vm282_vm3, %v921_v38, %v939_v60  ;;  %v1861_v46 = vld [vmem:[%s2370_s2 + $0xa8] sm:$0xff]  }
 0x708   :  { %v953_v49 = vsel %vm287_vm4, %v947_v48, 0.0  ;;  %v1863_v47 = vld [vmem:[%s2370_s2 + $0x68] sm:$0xff]  }
 0x709   :  { %v954_v50 = vadd.f32 %v953_v49, %v952_v5 }
 0x70b   :  { %v955_v51 = vrot.slane %v954_v50, 4 }
 0x70d   :  { %v956_v57 = vadd.f32 %v955_v51, %v954_v50 }
 0x70f   :  { %v957_v58 = vrot.slane %v956_v57, 2 }
 0x711   :  { %v958_v52 = vadd.f32 %v957_v58, %v956_v57 }
 0x713   :  { %v959_v53 = vrot.slane %v958_v52, 1 }
 0x715   :  { %v960_v54 = vadd.f32 %v959_v53, %v958_v52  ;;  %v118_v52 = vld [vmem:[%s2373_s3 + $0x50] sm:$0xff] }
 0x717   :  { %v961_v61 = vmul.f32 0.03125, %v960_v54 }
 0x719   :  { %v962_v6 = vmul.f32 %v961_v61, %v961_v61  ;;  %v969_v11 = vsub.f32 %v2172_v29, %v961_v61  ;;  %v970_v15 = vsub.f32 %v913_v37, %v961_v61  ;;  %v972_v16 = vsub.f32 %v921_v38, %v961_v61  ;;  %v1841_v38 = vld [vmem:[%s2370_s2 + $0xd8] sm:$0xff]  }
 0x71a   :  { %1673 = vmatprep.subr.bf16.mxu0 %v1841_v38 }
 0x71b   :  { %964 = vrot.lane.b32.xlu0 %v962_v6, %s1882_s0  ;;  %v114_v6 = vld [vmem:[%s2373_s3 + $0x30] sm:$0xff] }
 0x78d   :  { %v965_v59 = vpop.permute.xlu0 %964 }
 0x78e   :  { %v967_v62 = vsub.f32 %v961_v61, %v965_v59 }
 0x790   :  { %v968_v63 = vmax.f32 %v967_v62, 0.0 }
 0x792   :  { %v973_v0 = vadd.f32 1e-05, %v968_v63  ;;  %v132_v63 = vunpack.c.l.bf16 %v118_v52 }
 0x794   :  { %1879 = vrsqrt.f32 %v973_v0  ;;  %v125_v0 = vunpack.c.h.bf16 %v114_v6 }
 0x7a1   :  { %v1880_v3 = vpop.eup %1879 }
 0x7a2   :  { %v978_v7 = vrot.slane %v1880_v3, %v1935_v13  ;;  %v971_v13 = vsub.f32 %v2174_v33, %v961_v61  ;;  %v116_v61 = vld [vmem:[%s2373_s3 + $0x40] sm:$0xff]  ;;  %v133_v3 = vunpack.c.h.bf16 %v118_v52 }
 0x7a3   :  { %v129_v1 = vunpack.c.h.bf16 %v116_v61  ;;  %v1860_v52 = vld [vmem:[%s2370_s2 + $0x100] sm:$0xff]  }
 0x7a4   :  { %980 = vrot.lane.b32.xlu1 %v978_v7, %s1883_s27  ;;  %v128_v7 = vunpack.c.l.bf16 %v116_v61  ;;  %v1865_v61 = vld [vmem:[%s2370_s2 + $0xa0] sm:$0xff]  }
 0x816   :  { %v981_v55 = vpop.permute.xlu1 %980 }
 0x817   :  { %v983_v18 = vmul.f32 %v981_v55, %v969_v11  ;;  %v984_v56 = vmul.f32 %v981_v55, %v970_v15  ;;  %v985_v21 = vmul.f32 %v981_v55, %v971_v13  ;;  %v986_v19 = vmul.f32 %v981_v55, %v972_v16  ;;  %v119_v13 = vld [vmem:[%s2373_s3 + $0x58] sm:$0xff] }
 0x818   :  { %v124_v11 = vunpack.c.l.bf16 %v114_v6  ;;  %v1866_v6 = vld [vmem:[%s2370_s2 + $0x130] sm:$0xff]  }
 0x819   :  { %v991_v23 = vmul.f32 %v990_v17, %v983_v18  ;;  %v992_v24 = vmul.f32 %v990_v17, %v984_v56  ;;  %v993_v12 = vmul.f32 %v990_v17, %v985_v21  ;;  %v994_v25 = vmul.f32 %v990_v17, %v986_v19 }
 0x81a   :  { %v135_v56 = vunpack.c.h.bf16 %v119_v13  ;;  %v120_v21 = vunpack.c.l.bf16 %v112_v4 }
 0x81b   :  { %v999_v26 = vadd.f32 %v1610_v22, %v991_v23  ;;  %v1000_v27 = vadd.f32 %v1610_v22, %v992_v24  ;;  %v1001_v31 = vadd.f32 %v1610_v22, %v993_v12  ;;  %v1002_v33 = vadd.f32 %v1610_v22, %v994_v25  ;;  %v117_v22 = vld [vmem:[%s2373_s3 + $0x48] sm:$0xff] }
 0x81c   :  { %v131_v12 = vunpack.c.h.bf16 %v117_v22 }
 0x81d   :  { %v1003_v28 = vmax.f32 %v999_v26, 0.0  ;;  %v1004_v29 = vmax.f32 %v1000_v27, 0.0  ;;  %v1005_v20 = vmax.f32 %v1001_v31, 0.0  ;;  %v1006_v34 = vmax.f32 %v1002_v33, 0.0  ;;  %v115_v27 = vld [vmem:[%s2373_s3 + $0x38] sm:$0xff] }
 0x81e   :  { %v127_v33 = vunpack.c.h.bf16 %v115_v27 }
 0x81f   :  { %v1007_v14 = vpack.c.bf16 %v1004_v29, %v1003_v28  ;;  %v1008_v37 = vpack.c.bf16 %v1006_v34, %v1005_v20  ;;  %v134_v29 = vunpack.c.l.bf16 %v119_v13  ;;  %v113_v34 = vld [vmem:[%s2373_s3 + $0x28] sm:$0xff] }
 0x820   :  { %v123_v38 = vunpack.c.h.bf16 %v113_v34 }
 0x821   :  { %1615 = vmatmul.mubr.msk.bf16.vlgmr.msra.gmra.mxu1 %vm282_vm3, %v1007_v14  ;;  %1617 = vmatmul.mubr.msk.bf16.vlgmr.msra.gmra.mxu0 %vm282_vm3, %v1007_v14 }
 0x822   :  { %1077 = vmatprep.mubr.bf16.mxu1 %v1887_v2  ;;  %1130 = vmatprep.mubr.bf16.mxu0 %v1887_v2 }
 0x823   :  { %1674 = vmatpush3.bf16.msra.mxu0 %v1842_v30 }
 0x824   :  { %1675 = vmatprep.subr.bf16.mxu0 %v1843_v39 }
 0x827   :  { %1676 = vmatpush3.bf16.msra.mxu0 %v1844_v40  ;;  %v126_v40 = vunpack.c.l.bf16 %v115_v27 }
 0x828   :  { %1677 = vmatprep.subr.bf16.mxu0 %v1845_v32 }
 0x829   :  { %1616 = vmatmul.mubr.msk.bf16.gmra.mxu1 %vm282_vm3, %v1008_v37  ;;  %1618 = vmatmul.mubr.msk.bf16.gmra.mxu0 %vm282_vm3, %v1008_v37  ;;  %v130_v37 = vunpack.c.l.bf16 %v117_v22 }
 0x82a   :  { %1200 = vmatprep.mubr.bf16.mxu1 %v1887_v2 }
 0x82b   :  { %1678 = vmatpush3.bf16.msra.mxu0 %v1847_v35 }
 0x82c   :  { %1679 = vmatprep.subr.bf16.mxu0 %v1849_v36 }
 0x82f   :  { %1680 = vmatpush3.bf16.msra.mxu0 %v1851_v41  ;;  %v122_v41 = vunpack.c.l.bf16 %v113_v34 }
 0x830   :  { %1681 = vmatprep.subr.bf16.mxu0 %v1853_v42 }
 0x833   :  { %1682 = vmatpush3.bf16.msra.mxu0 %v1855_v43  ;;  %v43_v43 = vld [vmem:[%s2370_s2 + $0x58] sm:$0xf] }
 0x834   :  { %1683 = vmatprep.subr.bf16.mxu0 %v1857_v44 }
 0x837   :  { %1684 = vmatpush3.bf16.msra.mxu0 %v1859_v45 }
 0x838   :  { %1685 = vmatprep.subr.bf16.mxu0 %v1861_v46 }
 0x83b   :  { %1686 = vmatpush3.bf16.msra.mxu0 %v1863_v47 }
 0x83c   :  { %1687 = vmatprep.subr.bf16.mxu0 %v1865_v61 }
 0x8e1   :  { %v1069_v60 = vpop.f32.mrf.mxu1  ;;  %v2267_v5 = vpop.f32.mrf.mxu0 }
 0x8e2   :  { %v1141_v20 = vmul.f32 %v1069_v60, %v120_v21  ;;  %v1143_v60 = vmul.f32 %v2267_v5, %v122_v41  ;;  %v1854_v5 = vld [vmem:[%s2370_s2 + $0x148] sm:$0xff]   ;;  %v1888_v21 = vmov 0.0  }
 0x8e3   :  { %v1071_v48 = vpop.f32.mrf.mxu1  ;;  %v1124_v49 = vpop.f32.mrf.mxu0 }
 0x8e4   :  { %v1142_v24 = vmul.f32 %v1071_v48, %v121_v10  ;;  %v1144_v44 = vmul.f32 %v1124_v49, %v123_v38  ;;  %v1846_v48 = vld [vmem:[%s2370_s2 + $0x158] sm:$0xff]  }
 0x8e5   :  { %v1073_v50 = vpop.f32.mrf.mxu1  ;;  %v1126_v51 = vpop.f32.mrf.mxu0  ;;  %v1848_v49 = vld [vmem:[%s2370_s2 + $0x118] sm:$0xff]  }
 0x8e6   :  { %v1145_v26 = vmul.f32 %v1073_v50, %v124_v11  ;;  %v1147_v45 = vmul.f32 %v1126_v51, %v126_v40  ;;  %v1850_v51 = vld [vmem:[%s2370_s2 + $0x150] sm:$0xff]   ;;  %v1654_v38 = vld [vmem:[%s2372_s1 + $0x18] ss:$0 sm:$0xff] }
 0x8e7   :  { %v1075_v57 = vpop.f32.mrf.mxu1  ;;  %v1128_v58 = vpop.f32.mrf.mxu0 }
 0x8e8   :  { %v1146_v17 = vmul.f32 %v1075_v57, %v125_v0  ;;  %v1157_v39 = vpack.c.bf16 %v1145_v26, %v1141_v20  ;;  %v1148_v35 = vmul.f32 %v1128_v58, %v127_v33  ;;  %v1159_v50 = vpack.c.bf16 %v1147_v45, %v1143_v60  ;;  %v1856_v57 = vld [vmem:[%s2370_s2 + $0x108] sm:$0xff]   ;;  %v1858_v58 = vld [vmem:[%s2370_s2 + $0x140] sm:$0xff]   ;;  %v1621_v26 = vld [vmem:[%s2372_s1 + $0x10] ss:$0 sm:$0xff] }
 0x8e9   :  { %v1079_v53 = vpop.f32.mrf.mxu1  ;;  %v1132_v54 = vpop.f32.mrf.mxu0  ;;  %v1870_v0 = vld [vmem:[%s2370_s2 + $0xe8] sm:$0xff]  }
 0x8ea   :  { %v1149_v19 = vmul.f32 %v1079_v53, %v128_v7  ;;  %v1158_v31 = vpack.c.bf16 %v1146_v17, %v1142_v24  ;;  %v1151_v42 = vmul.f32 %v1132_v54, %v130_v37  ;;  %v1160_v47 = vpack.c.bf16 %v1148_v35, %v1144_v44  ;;  %v1862_v53 = vld [vmem:[%s2370_s2 + $0x138] sm:$0xff]  }
 0x8eb   :  { %v1081_v59 = vpop.f32.mrf.mxu1  ;;  %v1134_v62 = vpop.f32.mrf.mxu0  ;;  %v1864_v54 = vld [vmem:[%s2370_s2 + $0xf8] sm:$0xff]  }
 0x8ec   :  { %v1150_v55 = vmul.f32 %v1081_v59, %v129_v1  ;;  %v1152_v30 = vmul.f32 %v1134_v62, %v131_v12  ;;  %v1867_v59 = vld [vmem:[%s2370_s2 + $0x60] sm:$0xff]   ;;  %v1868_v62 = vld [vmem:[%s2370_s2 + $0xf0] sm:$0xff]  }
 0x8ed   :  { %v1083_v8 = vpop.f32.mrf.mxu1  ;;  %v1136_v9 = vpop.f32.mrf.mxu0  ;;  %1688 = vmatpush3.bf16.msra.mxu0 %v1867_v59  ;;  %v1871_v1 = vld [vmem:[%s2370_s2 + $0x120] sm:$0xff]  }
 0x8ee   :  { %v1153_v15 = vmul.f32 %v1083_v8, %v132_v63  ;;  %v1155_v32 = vmul.f32 %v1136_v9, %v134_v29  ;;  %v1869_v63 = vld [vmem:[%s2370_s2 + $0x128] sm:$0xff]   ;;  %1750 = vmatprep.subr.bf16.mxu0 %v1888_v21 }
 0x8ef   :  { %v1085_v16 = vpop.f32.mrf.mxu1  ;;  %v1138_v23 = vpop.f32.mrf.mxu0 }
 0x8f0   :  { %v1154_v18 = vmul.f32 %v1085_v16, %v133_v3  ;;  %v1161_v28 = vpack.c.bf16 %v1153_v15, %v1149_v19  ;;  %v1156_v14 = vmul.f32 %v1138_v23, %v135_v56  ;;  %v1163_v46 = vpack.c.bf16 %v1155_v32, %v1151_v42  ;;  %v1872_v3 = vld [vmem:[%s2370_s2 + $0xe0] sm:$0xff]   ;;  %v1873_v56 = vld [vmem:[%s2370_s2 + $0x50] sm:$0xff]   ;;  %v1874_v19 = vld [vmem:[%s2370_s2 + $0x48] sm:$0xff]  }
 0x8f2   :  { %v1162_v25 = vpack.c.bf16 %v1154_v18, %v1150_v55  ;;  %v1164_v36 = vpack.c.bf16 %v1156_v14, %v1152_v30 }
 0x8f4   :  { %1180 = vmatprep.subr.bf16.mxu1 %v1162_v25 }
 0x8f5   :  { %1181 = vmatpush1.bf16.msra.mxu1 %v1161_v28 }
 0x8f6   :  { %1182 = vmatprep.subr.bf16.mxu1 %v1158_v31 }
 0x8f9   :  { %1183 = vmatpush1.bf16.msra.mxu1 %v1157_v39 }
 0x8fa   :  { %1221 = vmatprep.subr.bf16.mxu1 %v1164_v36 }
 0x8fc   :  { %1619 = vmatmul.mubr.msk.bf16.vlgmr.msra.gmra.mxu1 %vm287_vm4, %v43_v43 }
 0x8fd   :  { %1222 = vmatpush1.bf16.msra.mxu1 %v1163_v46  ;;  %1241 = vmatprep.mubr.bf16.mxu1 %v1887_v2  ;;  %v1852_v2 = vld [vmem:[%s2370_s2 + $0x110] sm:$0xff]  }
 0x8fe   :  { %1223 = vmatprep.subr.bf16.mxu1 %v1160_v47 }
 0x901   :  { %1224 = vmatpush1.bf16.msra.mxu1 %v1159_v50 }
 0x902   :  { %1695 = vmatprep.subr.bf16.mxu1 %v1846_v48 }
 0x904   :  { %1620 = vmatmul.mubr.msk.bf16.vlgmr.msra.gmra.mxu1 %vm287_vm4, %v43_v43 }
 0x905   :  { %1696 = vmatpush3.bf16.msra.mxu1 %v1848_v49 }
 0x906   :  { %1697 = vmatprep.subr.bf16.mxu1 %v1850_v51 }
 0x909   :  { %1698 = vmatpush3.bf16.msra.mxu1 %v1852_v2 }
 0x90a   :  { %1699 = vmatprep.subr.bf16.mxu1 %v1854_v5 }
 0x90d   :  { %1700 = vmatpush3.bf16.msra.mxu1 %v1856_v57 }
 0x90e   :  { %1701 = vmatprep.subr.bf16.mxu1 %v1858_v58 }
 0x911   :  { %1702 = vmatpush3.bf16.msra.mxu1 %v1860_v52 }
 0x912   :  { %1703 = vmatprep.subr.bf16.mxu1 %v1862_v53 }
 0x915   :  { %1704 = vmatpush3.bf16.msra.mxu1 %v1864_v54 }
 0x916   :  { %1705 = vmatprep.subr.bf16.mxu1 %v1866_v6 }
 0x919   :  { %1706 = vmatpush3.bf16.msra.mxu1 %v1868_v62 }
 0x91a   :  { %1707 = vmatprep.subr.bf16.mxu1 %v1869_v63 }
 0x91d   :  { %1708 = vmatpush3.bf16.msra.mxu1 %v1870_v0 }
 0x91e   :  { %1709 = vmatprep.subr.bf16.mxu1 %v1871_v1 }
 0x921   :  { %1710 = vmatpush3.bf16.msra.mxu1 %v1872_v3 }
 0x9bc   :  { %v1202_v4 = vpop.f32.mrf.mxu1 }
 0x9bd   :  { %v1250_v9 = vpack.c.bf16 %v1202_v4, %v1202_v4 }
 0x9be   :  { %v1204_v7 = vpop.f32.mrf.mxu1 }
 0x9bf   :  { %v1251_v8 = vpack.c.bf16 %v1204_v7, %v1204_v7 }
 0x9c0   :  { %v1206_v10 = vpop.f32.mrf.mxu1 }
 0x9c1   :  { %1482 = vmatprep.mubr.bf16.mxu0 %v1251_v8 }
 0x9c2   :  { %v1207_v11 = vpop.f32.mrf.mxu1  ;;  %1483 = vmatmul.mubr.bf16.vlgmr.msra.gmra.mxu0 %v1250_v9 }
 0x9c3   :  { %1754 = vmatprep.mubr.msk.bf16.mxu0 %vm1889_vm2, %v1888_v21  ;;  %1751 = vmatpush3.bf16.msra.mxu0 %v1873_v56 }
 0x9c4   :  { %v1243_v15 = vpop.f32.mrf.mxu1  ;;  %1752 = vmatprep.subr.bf16.mxu0 %v1888_v21 }
 0x9c5   :  { %v1252_v17 = vpack.c.bf16 %v1243_v15, %v1243_v15 }
 0x9c6   :  { %v1245_v13 = vpop.f32.mrf.mxu1 }
 0x9c7   :  { %v1253_v16 = vpack.c.bf16 %v1245_v13, %v1245_v13  ;;  %1753 = vmatpush3.bf16.msra.mxu0 %v1874_v19 }
 0x9c8   :  { %v1247_v55 = vpop.f32.mrf.mxu1 }
 0x9c9   :  { %1522 = vmatprep.mubr.bf16.mxu1 %v1253_v16 }
 0x9ca   :  { %1523 = vmatmul.mubr.bf16.vlgmr.msra.gmra.mxu1 %v1252_v17  ;;  %v1248_v18 = vpop.f32.mrf.mxu1 }
 0xa82   :  { %v1689_v22 = vpop.f32.mrf.mxu0 }
 0xa84   :  { %v1690_v23 = vpop.f32.mrf.mxu0 }
 0xa85   :  { %v1691_v25 = vadd.f32 %v1690_v23, %v1689_v22 }
 0xa86   :  { %v1692_v24 = vpop.f32.mrf.mxu0 }
 0xa87   :  { %v1485_v29 = vadd.f32 %v1691_v25, %v1621_v26 }
 0xa88   :  { %v1693_v12 = vpop.f32.mrf.mxu0 }
 0xa8a   :  { %v1711_v27 = vpop.f32.mrf.mxu1 }
 0xa8c   :  { %v1712_v28 = vpop.f32.mrf.mxu1 }
 0xa8d   :  { %v1713_v31 = vadd.f32 %v1712_v28, %v1711_v27 }
 0xa8e   :  { %v1714_v33 = vpop.f32.mrf.mxu1 }
 0xa8f   :  { %v1525_v14 = vadd.f32 %v1713_v31, %v1485_v29 }
 0xa90   :  { %v1715_v20 = vpop.f32.mrf.mxu1 }
 0xa91   :  { %v1530_v34 = vmax.f32 %v1525_v14, 0.0 }
 0xa93   :  { %v1531_v37 = vpack.c.bf16 %v1530_v34, %v1530_v34 }
 0xa95   :  { %1755 = vmatmul.mubr.msk.bf16.vlgmr.msra.gmra.mxu0 %vm287_vm4, %v1531_v37 }
 0xb55   :  { %v1585_v30 = vpop.f32.mrf.mxu0 }
 0xb56   :  { %v1586_v39 = vadd.f32 %v1654_v38, %v1585_v30 }
 0xb57   :  { %v1756_v40 = vpop.f32.mrf.mxu0 }
 0xb58   :  { %1591 = vst [vmem:[%s2374_s4] sm:$0xff] %v1586_v39 }
 0xb59   :  { %v1588_v32 = vpop.f32.mrf.mxu0 }
 0xb5b   :  { %v1757_v35 = vpop.f32.mrf.mxu0 }

</bundles_post_ra>
